<compile_context>
chip_gen: v5e
topology: v5e:2x2
jax: 0.10.0
libtpu: 0.0.40
codegen_flags: <defaults>
</compile_context>

<pallas_src>
import functools

import numpy as np
import jax
import jax.numpy as jnp
from jax import lax
from jax.experimental import pallas as pl
from jax.experimental.pallas import tpu as pltpu

KSIZE = 7
PAD = (KSIZE - 1) // 2
BN_EPS = 1e-5

_VMEM = pl.BlockSpec(memory_space=pltpu.MemorySpace.VMEM)
_SMEM = pl.BlockSpec(memory_space=pltpu.MemorySpace.SMEM)


# ---------------------------------------------------------------------------
# K1: per-channel average / max pooling over H*W (lane-dense reduce).
# ---------------------------------------------------------------------------
def _pool_kernel(x_ref, avg_ref, max_ref):
    x = x_ref[...].astype(jnp.float32)            # (N, bc, HW)
    avg_ref[0] = jnp.mean(x, axis=2)
    max_ref[0] = jnp.max(x, axis=2)


# ---------------------------------------------------------------------------
# K2: shared MLP + sigmoid -> channel-attention gate (tiny, gridless).
# avg/max go through the MLP separately: no runtime concatenation.
# ---------------------------------------------------------------------------
def _ca_kernel(avg_ref, max_ref, w1t_ref, b1_ref, w2t_ref, b2_ref, ca_ref):
    def mlp(v):
        h = jnp.dot(v, w1t_ref[...], preferred_element_type=jnp.float32) + b1_ref[...]
        h = jnp.maximum(h, 0.0)
        return jnp.dot(h, w2t_ref[...], preferred_element_type=jnp.float32) + b2_ref[...]

    ca_ref[...] = jax.nn.sigmoid(mlp(avg_ref[...]) + mlp(max_ref[...]))


# ---------------------------------------------------------------------------
# K3: channel pool of x * ca (running max / running sum over C-blocks).
# The C-block grid axis is a reduction ("arbitrary"); the outputs act as
# VMEM-resident accumulators (constant output block index).
# ---------------------------------------------------------------------------
def _cpool_kernel(x_ref, ca_ref, cmax_ref, cmean_ref, *, inv_c):
    j = pl.program_id(0)
    x_ca = x_ref[...].astype(jnp.float32) * ca_ref[0][:, :, None]   # (N, bc, HW)
    part_max = jnp.max(x_ca, axis=1)                                # (N, HW)
    part_sum = jnp.sum(x_ca, axis=1)                                # (N, HW)

    @pl.when(j == 0)
    def _():
        cmax_ref[...] = part_max
        cmean_ref[...] = part_sum

    @pl.when(j > 0)
    def _():
        cmax_ref[...] = jnp.maximum(cmax_ref[...], part_max)
        cmean_ref[...] = cmean_ref[...] + part_sum

    @pl.when(j == pl.num_programs(0) - 1)
    def _():
        cmean_ref[...] = cmean_ref[...] * inv_c


# ---------------------------------------------------------------------------
# K4: spatial gate = sigmoid(BN(conv7x7([cmax, cmean]))).
# Banded form of the 'same'-padded 7x7 conv (2 -> 1 channels, no bias): for each
# of the 7 row offsets d, the contribution of input row (i+d-3) to output row i
# is a (W, W) band matmul.  MXU operands are bf16, accumulation is f32.
# BatchNorm statistics are global over the whole (N, H, W) conv map.
# ---------------------------------------------------------------------------
def _sa_kernel(cmax_ref, cmean_ref, kmax_ref, kmean_ref, bn_ref, sa_ref,
               pmax_ref, pmean_ref, *, H, W):
    N = cmax_ref.shape[0]

    # Zero-padded (over rows) copies of the two pooled maps: (N, H + 6, W).
    pmax_ref[...] = jnp.zeros_like(pmax_ref)
    pmean_ref[...] = jnp.zeros_like(pmean_ref)
    pmax_ref[:, PAD:PAD + H, :] = cmax_ref[...]
    pmean_ref[:, PAD:PAD + H, :] = cmean_ref[...]

    acc = jnp.zeros((N * H, W), jnp.float32)
    for d in range(KSIZE):                         # static unroll over row offsets
        sm = pmax_ref[:, d:d + H, :].reshape(N * H, W).astype(jnp.bfloat16)
        sn = pmean_ref[:, d:d + H, :].reshape(N * H, W).astype(jnp.bfloat16)
        acc = acc + jnp.dot(sm, kmax_ref[d], preferred_element_type=jnp.float32)
        acc = acc + jnp.dot(sn, kmean_ref[d], preferred_element_type=jnp.float32)

    # BatchNorm2d(1), training-mode biased batch statistics over all N*H*W.
    mu = jnp.mean(acc)
    var = jnp.mean((acc - mu) ** 2)
    y = (acc - mu) * lax.rsqrt(var + BN_EPS) * bn_ref[0] + bn_ref[1]
    sa_ref[...] = jax.nn.sigmoid(y).reshape(N, H, W)


# ---------------------------------------------------------------------------
# K5: final gating  out = x * ca * sa  (dominant, lane-dense store).
# ---------------------------------------------------------------------------
def _gate_kernel(x_ref, ca_ref, sa_ref, o_ref):
    x = x_ref[...].astype(jnp.float32)                           # (N, bc, HW)
    gate = ca_ref[0][:, :, None] * sa_ref[...][:, None, :]       # (N, bc, HW)
    o_ref[...] = (x * gate).astype(o_ref.dtype)


# ---------------------------------------------------------------------------
# Host-side setup (runs ONCE, not per forward call).
# ---------------------------------------------------------------------------
def build_band_matrices(conv_w, W, dtype=jnp.bfloat16):
    """Per-row-offset banded form of the 7x7 conv:
         conv[n, i, :] = sum_d pad(cmax)[n, i+d, :] @ kmax[d]
                        + pad(cmean)[n, i+d, :] @ kmean[d]
       with K_c[d, jj, j] = w[0, c, d, jj - j + PAD] for |jj - j| <= PAD.
       O(K * W^2) memory (vs O(HW^2) dense Toeplitz), independent of H."""
    cw = np.asarray(conv_w, np.float32)           # (1, 2, K, K) OIHW; ch 0 = max, 1 = mean
    K = cw.shape[-1]
    pad = (K - 1) // 2
    mats = np.zeros((2, K, W, W), np.float32)
    for c in range(2):
        for d in range(K):
            for jj in range(W):
                for j in range(max(0, jj - pad), min(W, jj + pad + 1)):
                    mats[c, d, jj, j] = cw[0, c, d, jj - j + pad]
    return jnp.asarray(mats[0], dtype), jnp.asarray(mats[1], dtype)


def make_cbam_params(w1t, b1, w2t, b2, conv_w, bn, W):
    """Build the device-side parameter bundle once (band-matrix construction is a
    host Python loop + H2D copy and must not run per forward call)."""
    kmax, kmean = build_band_matrices(conv_w, W)
    return dict(
        w1t=jnp.asarray(w1t, jnp.float32), b1=jnp.asarray(b1, jnp.float32),
        w2t=jnp.asarray(w2t, jnp.float32), b2=jnp.asarray(b2, jnp.float32),
        kmax=kmax, kmean=kmean, bn=jnp.asarray(bn, jnp.float32))


def _pick_block_c(N, C, HW, itemsize, target_bytes=2 << 20):
    """Largest C-block that (a) is a multiple of 8 and divides C, (b) keeps the
    per-step x block under target_bytes, (c) leaves >= 2 grid steps when possible
    (so v7x's two TensorCores both get work and the DMA pipeline has overlap)."""
    if C < 16:
        return C
    cap = max(8, ((C // 2) // 8) * 8)
    budget = max(8, (int(target_bytes // max(1, N * HW * itemsize)) // 8) * 8)
    bc = (min(cap, budget) // 8) * 8
    while bc >= 8 and C % bc:
        bc -= 8
    return bc if bc >= 8 else C


def _vmem_limit(block_bytes):
    # double-buffered blocks + slack, clamped to stay safe on v7x (64 MiB VMEM).
    return int(min(64 << 20, max(16 << 20, 2 * block_bytes + (4 << 20))))


# ---------------------------------------------------------------------------
# Forward pass.
# ---------------------------------------------------------------------------
def cbam_forward(x, params):
    N, C, H, W = x.shape
    HW = H * W
    x_flat = x.reshape(N, C, HW)                   # lane-dense big-tensor layout

    bc = _pick_block_c(N, C, HW, x.dtype.itemsize)
    gC = C // bc
    x_blk_bytes = N * bc * HW * x.dtype.itemsize

    cparams_par = pltpu.CompilerParams(
        dimension_semantics=("parallel",),
        vmem_limit_bytes=_vmem_limit(2 * x_blk_bytes))
    cparams_red = pltpu.CompilerParams(
        dimension_semantics=("arbitrary",),
        vmem_limit_bytes=_vmem_limit(x_blk_bytes))

    x_spec = pl.BlockSpec((N, bc, HW), lambda j: (0, j, 0))
    cblk_spec = pl.BlockSpec((1, N, bc), lambda j: (j, 0, 0))       # per-channel gates/pools
    full_nhw_spec = pl.BlockSpec((N, HW), lambda j: (0, 0))

    # ---- K1: HW pooling ---------------------------------------------------
    avg_blk, max_blk = pl.pallas_call(
        _pool_kernel,
        grid=(gC,),
        in_specs=[x_spec],
        out_specs=(cblk_spec, cblk_spec),
        out_shape=(jax.ShapeDtypeStruct((gC, N, bc), jnp.float32),
                   jax.ShapeDtypeStruct((gC, N, bc), jnp.float32)),
        compiler_params=cparams_par,
        cost_estimate=pl.CostEstimate(
            flops=2 * N * C * HW, transcendentals=0,
            bytes_accessed=N * C * HW * x.dtype.itemsize),
    )(x_flat)

    # ---- K2: channel gate (tiny) -------------------------------------------
    avg_nc = avg_blk.transpose(1, 0, 2).reshape(N, C)   # tiny XLA glue
    max_nc = max_blk.transpose(1, 0, 2).reshape(N, C)
    ca = pl.pallas_call(
        _ca_kernel,
        out_shape=jax.ShapeDtypeStruct((N, C), jnp.float32),
        in_specs=[_VMEM] * 6,
        out_specs=_VMEM,
    )(avg_nc, max_nc, params["w1t"], params["b1"], params["w2t"], params["b2"])
    ca_blk = ca.reshape(N, gC, bc).transpose(1, 0, 2)   # (gC, N, bc) for blocked consumers

    # ---- K3: channel pool of x * ca ----------------------------------------
    cmax, cmean = pl.pallas_call(
        functools.partial(_cpool_kernel, inv_c=1.0 / C),
        grid=(gC,),
        in_specs=[x_spec, cblk_spec],
        out_specs=(full_nhw_spec, full_nhw_spec),
        out_shape=(jax.ShapeDtypeStruct((N, HW), jnp.float32),
                   jax.ShapeDtypeStruct((N, HW), jnp.float32)),
        compiler_params=cparams_red,
        cost_estimate=pl.CostEstimate(
            flops=3 * N * C * HW, transcendentals=0,
            bytes_accessed=N * C * HW * x.dtype.itemsize),
    )(x_flat, ca_blk)

    # ---- K4: spatial gate (small; global BN statistics) ---------------------
    sa3 = pl.pallas_call(
        functools.partial(_sa_kernel, H=H, W=W),
        out_shape=jax.ShapeDtypeStruct((N, H, W), jnp.float32),
        in_specs=[_VMEM, _VMEM, _VMEM, _VMEM, _SMEM],
        out_specs=_VMEM,
        scratch_shapes=[pltpu.VMEM((N, H + 2 * PAD, W), jnp.float32),
                        pltpu.VMEM((N, H + 2 * PAD, W), jnp.float32)],
    )(cmax.reshape(N, H, W), cmean.reshape(N, H, W),
      params["kmax"], params["kmean"], params["bn"])
    sa = sa3.reshape(N, HW)

    # ---- K5: final gating ----------------------------------------------------
    out_flat = pl.pallas_call(
        _gate_kernel,
        grid=(gC,),
        in_specs=[x_spec, cblk_spec, full_nhw_spec],
        out_specs=x_spec,
        out_shape=jax.ShapeDtypeStruct((N, C, HW), x.dtype),
        compiler_params=cparams_par,
        cost_estimate=pl.CostEstimate(
            flops=2 * N * C * HW, transcendentals=0,
            bytes_accessed=2 * N * C * HW * x.dtype.itemsize),
    )(x_flat, ca_blk, sa)

    return out_flat.reshape(N, C, H, W)


# ---------------------------------------------------------------------------
# Pure-JAX reference (for validation).
# ---------------------------------------------------------------------------
def cbam_reference(x, w1t, b1, w2t, b2, conv_w, bn, *, conv_operands_bf16=False):
    avg = jnp.mean(x, axis=(2, 3))
    mx = jnp.max(x, axis=(2, 3))

    def mlp(v):
        return jax.nn.relu(v @ w1t + b1) @ w2t + b2

    ca = jax.nn.sigmoid(mlp(avg) + mlp(mx))
    x_ca = x * ca[:, :, None, None]

    cp = jnp.stack([jnp.max(x_ca, axis=1), jnp.mean(x_ca, axis=1)], axis=1)
    w = conv_w
    if conv_operands_bf16:        # mirror the kernel's bf16 MXU operands (f32 accumulate)
        cp = cp.astype(jnp.bfloat16).astype(jnp.float32)
        w = w.astype(jnp.bfloat16).astype(jnp.float32)
    conv = lax.conv_general_dilated(
        cp, w, window_strides=(1, 1), padding=[(PAD, PAD), (PAD, PAD)],
        dimension_numbers=("NCHW", "OIHW", "NCHW"))
    mu = jnp.mean(conv)
    var = jnp.mean((conv - mu) ** 2)
    y = (conv - mu) * lax.rsqrt(var + BN_EPS) * bn[0] + bn[1]
    return x_ca * jax.nn.sigmoid(y)


if __name__ == "__main__":
    # channel_in must be >= reduction_ratio (=16) -> C=32, Cr=2.
    N, C, H, W = 2, 32, 16, 16
    Cr = C // 16

    key = jax.random.PRNGKey(0)
    kx, k1, kb1, k2, kb2, kc = jax.random.split(key, 6)

    x = jax.random.normal(kx, (N, C, H, W), jnp.float32)

    # Shared-MLP parameters (Linear(C->Cr), Linear(Cr->C)); stored transposed so
    # the kernel computes v @ W^T + b directly.
    w1t = jax.random.normal(k1, (C, Cr), jnp.float32) * 0.1
    b1 = jax.random.normal(kb1, (1, Cr), jnp.float32) * 0.1
    w2t = jax.random.normal(k2, (Cr, C), jnp.float32) * 0.1
    b2 = jax.random.normal(kb2, (1, C), jnp.float32) * 0.1

    # Conv2d(2 -> 1, kernel 7x7, bias=False) weight in OIHW.
    conv_w = jax.random.normal(kc, (1, 2, KSIZE, KSIZE), jnp.float32) * 0.1

    # BatchNorm2d(1) affine params: gamma=1, beta=0 (PyTorch default init).
    bn = jnp.array([1.0, 0.0], jnp.float32)

    # Band matrices & params built ONCE (not per call).
    params = make_cbam_params(w1t, b1, w2t, b2, conv_w, bn, W)

    out = jax.jit(cbam_forward)(x, params)
    out = jax.block_until_ready(out)
    assert out.shape == (N, C, H, W)

    # Primary check: precision-matched reference (the only intended deviation
    # from f32 math is the bf16 MXU operands of the spatial conv).
    ref_bf16 = cbam_reference(x, w1t, b1, w2t, b2, conv_w, bn, conv_operands_bf16=True)
    assert jnp.allclose(out, ref_bf16, atol=2e-3, rtol=2e-3), \
        "mismatch vs precision-matched JAX reference"

    # Sanity check against the pure-f32 reference (loose: bf16 conv operands).
    ref_f32 = cbam_reference(x, w1t, b1, w2t, b2, conv_w, bn)
    assert jnp.allclose(out, ref_f32, atol=5e-2, rtol=5e-2), \
        "mismatch vs f32 JAX reference"

    print("KERNEL_OK")
</pallas_src>

<mosaic_0001>
module attributes {stable_mosaic.version = 11 : i64} {
  func.func @_pool_kernel(%arg0: i32, %arg1: memref<2x16x256xf32, #tpu.memory_space<vmem>>, %arg2: memref<1x2x16xf32, #tpu.memory_space<vmem>>, %arg3: memref<1x2x16xf32, #tpu.memory_space<vmem>>) attributes {dimension_semantics = [#tpu.dimension_semantics<parallel>], iteration_bounds = array<i64: 2>, scalar_prefetch = 0 : i64, scratch_operands = 0 : i64, tpu.core_type = #tpu.core_type<tc>, window_params = [{transform_indices = @transform_0, window_bounds = array<i64: 2, 16, 256>}, {transform_indices = @transform_1, window_bounds = array<i64: 1, 2, 16>}, {transform_indices = @transform_2, window_bounds = array<i64: 1, 2, 16>}]} {
    %c0 = arith.constant 0 : index
    %c0_0 = arith.constant 0 : index
    %c0_1 = arith.constant 0 : index
    %0 = vector.load %arg1[%c0, %c0_0, %c0_1] : memref<2x16x256xf32, #tpu.memory_space<vmem>>, vector<2x16x256xf32>
    %cst = arith.constant dense<0.000000e+00> : vector<2x16xf32>
    %1 = vector.multi_reduction <add>, %0, %cst [2] : vector<2x16x256xf32> to vector<2x16xf32>
    %cst_2 = arith.constant 2.560000e+02 : f32
    %2 = vector.broadcast %cst_2 : f32 to vector<2x16xf32>
    %3 = arith.divf %1, %2 : vector<2x16xf32>
    %c0_3 = arith.constant 0 : index
    %c0_4 = arith.constant 0 : index
    %c0_5 = arith.constant 0 : index
    %4 = vector.load %arg2[%c0_3, %c0_4, %c0_5] : memref<1x2x16xf32, #tpu.memory_space<vmem>>, vector<1x2x16xf32>
    %5 = vector.shape_cast %4 : vector<1x2x16xf32> to vector<2x16xf32>
    %6 = vector.shape_cast %3 : vector<2x16xf32> to vector<1x2x16xf32>
    tpu.vector_store %arg2[%c0_3, %c0_4, %c0_5], %6 {strides = array<i32>} : memref<1x2x16xf32, #tpu.memory_space<vmem>>, vector<1x2x16xf32>,
    %cst_6 = arith.constant dense<0xFF800000> : vector<2x16xf32>
    %7 = vector.multi_reduction <maximumf>, %0, %cst_6 [2] : vector<2x16x256xf32> to vector<2x16xf32>
    %c0_7 = arith.constant 0 : index
    %c0_8 = arith.constant 0 : index
    %c0_9 = arith.constant 0 : index
    %8 = vector.load %arg3[%c0_7, %c0_8, %c0_9] : memref<1x2x16xf32, #tpu.memory_space<vmem>>, vector<1x2x16xf32>
    %9 = vector.shape_cast %8 : vector<1x2x16xf32> to vector<2x16xf32>
    %10 = vector.shape_cast %7 : vector<2x16xf32> to vector<1x2x16xf32>
    tpu.vector_store %arg3[%c0_7, %c0_8, %c0_9], %10 {strides = array<i32>} : memref<1x2x16xf32, #tpu.memory_space<vmem>>, vector<1x2x16xf32>,
    return
  }
  func.func @transform_0(%arg0: i32) -> (i32, i32, i32) {
    %c0_i32 = arith.constant 0 : i32
    %c0_i32_0 = arith.constant 0 : i32
    %c0_i32_1 = arith.constant 0 : i32
    return %c0_i32, %arg0, %c0_i32_0 : i32, i32, i32
  }
  func.func @transform_1(%arg0: i32) -> (i32, i32, i32) {
    %c0_i32 = arith.constant 0 : i32
    %c0_i32_0 = arith.constant 0 : i32
    %c0_i32_1 = arith.constant 0 : i32
    return %arg0, %c0_i32, %c0_i32_0 : i32, i32, i32
  }
  func.func @transform_2(%arg0: i32) -> (i32, i32, i32) {
    %c0_i32 = arith.constant 0 : i32
    %c0_i32_0 = arith.constant 0 : i32
    %c0_i32_1 = arith.constant 0 : i32
    return %arg0, %c0_i32, %c0_i32_0 : i32, i32, i32
  }
}

module attributes {stable_mosaic.version = 11 : i64} {
  func.func @_ca_kernel(%arg0: memref<2x32xf32, #tpu.memory_space<vmem>>, %arg1: memref<2x32xf32, #tpu.memory_space<vmem>>, %arg2: memref<32x2xf32, #tpu.memory_space<vmem>>, %arg3: memref<1x2xf32, #tpu.memory_space<vmem>>, %arg4: memref<2x32xf32, #tpu.memory_space<vmem>>, %arg5: memref<1x32xf32, #tpu.memory_space<vmem>>, %arg6: memref<2x32xf32, #tpu.memory_space<vmem>>) attributes {dimension_semantics = [], scalar_prefetch = 0 : i64, scratch_operands = 0 : i64, tpu.core_type = #tpu.core_type<tc>} {
    %c0 = arith.constant 0 : index
    %c0_0 = arith.constant 0 : index
    %0 = vector.load %arg0[%c0, %c0_0] : memref<2x32xf32, #tpu.memory_space<vmem>>, vector<2x32xf32>
    %c0_1 = arith.constant 0 : index
    %c0_2 = arith.constant 0 : index
    %1 = vector.load %arg2[%c0_1, %c0_2] : memref<32x2xf32, #tpu.memory_space<vmem>>, vector<32x2xf32>
    %cst = arith.constant dense<0.000000e+00> : vector<2x2xf32>
    %2 = tpu.matmul %0, %1, %cst {dimension_numbers = #tpu.dot_dimension_numbers<[1], [0], [0], [1], [0, 0, 1, 1], [], []>} : vector<2x32xf32>, vector<32x2xf32>, vector<2x2xf32> -> vector<2x2xf32>
    %c0_3 = arith.constant 0 : index
    %c0_4 = arith.constant 0 : index
    %3 = vector.load %arg3[%c0_3, %c0_4] : memref<1x2xf32, #tpu.memory_space<vmem>>, vector<1x2xf32>
    %4 = vector.broadcast %3 : vector<1x2xf32> to vector<2x2xf32>
    %5 = arith.addf %2, %4 : vector<2x2xf32>
    %cst_5 = arith.constant 0.000000e+00 : f32
    %6 = vector.broadcast %cst_5 : f32 to vector<2x2xf32>
    %7 = arith.maximumf %5, %6 : vector<2x2xf32>
    %c0_6 = arith.constant 0 : index
    %c0_7 = arith.constant 0 : index
    %8 = vector.load %arg4[%c0_6, %c0_7] : memref<2x32xf32, #tpu.memory_space<vmem>>, vector<2x32xf32>
    %cst_8 = arith.constant dense<0.000000e+00> : vector<2x32xf32>
    %9 = tpu.matmul %7, %8, %cst_8 {dimension_numbers = #tpu.dot_dimension_numbers<[1], [0], [0], [1], [0, 0, 1, 1], [], []>} : vector<2x2xf32>, vector<2x32xf32>, vector<2x32xf32> -> vector<2x32xf32>
    %c0_9 = arith.constant 0 : index
    %c0_10 = arith.constant 0 : index
    %10 = vector.load %arg5[%c0_9, %c0_10] : memref<1x32xf32, #tpu.memory_space<vmem>>, vector<1x32xf32>
    %11 = vector.broadcast %10 : vector<1x32xf32> to vector<2x32xf32>
    %12 = arith.addf %9, %11 : vector<2x32xf32>
    %c0_11 = arith.constant 0 : index
    %c0_12 = arith.constant 0 : index
    %13 = vector.load %arg1[%c0_11, %c0_12] : memref<2x32xf32, #tpu.memory_space<vmem>>, vector<2x32xf32>
    %c0_13 = arith.constant 0 : index
    %c0_14 = arith.constant 0 : index
    %14 = vector.load %arg2[%c0_13, %c0_14] : memref<32x2xf32, #tpu.memory_space<vmem>>, vector<32x2xf32>
    %cst_15 = arith.constant dense<0.000000e+00> : vector<2x2xf32>
    %15 = tpu.matmul %13, %14, %cst_15 {dimension_numbers = #tpu.dot_dimension_numbers<[1], [0], [0], [1], [0, 0, 1, 1], [], []>} : vector<2x32xf32>, vector<32x2xf32>, vector<2x2xf32> -> vector<2x2xf32>
    %c0_16 = arith.constant 0 : index
    %c0_17 = arith.constant 0 : index
    %16 = vector.load %arg3[%c0_16, %c0_17] : memref<1x2xf32, #tpu.memory_space<vmem>>, vector<1x2xf32>
    %17 = vector.broadcast %16 : vector<1x2xf32> to vector<2x2xf32>
    %18 = arith.addf %15, %17 : vector<2x2xf32>
    %cst_18 = arith.constant 0.000000e+00 : f32
    %19 = vector.broadcast %cst_18 : f32 to vector<2x2xf32>
    %20 = arith.maximumf %18, %19 : vector<2x2xf32>
    %c0_19 = arith.constant 0 : index
    %c0_20 = arith.constant 0 : index
    %21 = vector.load %arg4[%c0_19, %c0_20] : memref<2x32xf32, #tpu.memory_space<vmem>>, vector<2x32xf32>
    %cst_21 = arith.constant dense<0.000000e+00> : vector<2x32xf32>
    %22 = tpu.matmul %20, %21, %cst_21 {dimension_numbers = #tpu.dot_dimension_numbers<[1], [0], [0], [1], [0, 0, 1, 1], [], []>} : vector<2x2xf32>, vector<2x32xf32>, vector<2x32xf32> -> vector<2x32xf32>
    %c0_22 = arith.constant 0 : index
    %c0_23 = arith.constant 0 : index
    %23 = vector.load %arg5[%c0_22, %c0_23] : memref<1x32xf32, #tpu.memory_space<vmem>>, vector<1x32xf32>
    %24 = vector.broadcast %23 : vector<1x32xf32> to vector<2x32xf32>
    %25 = arith.addf %22, %24 : vector<2x32xf32>
    %26 = arith.addf %12, %25 : vector<2x32xf32>
    %27 = arith.negf %26 : vector<2x32xf32>
    %28 = math.exp %27 : vector<2x32xf32>
    %cst_24 = arith.constant 1.000000e+00 : f32
    %29 = vector.broadcast %cst_24 : f32 to vector<2x32xf32>
    %30 = arith.addf %29, %28 : vector<2x32xf32>
    %31 = arith.divf %29, %30 : vector<2x32xf32>
    %c0_25 = arith.constant 0 : index
    %c0_26 = arith.constant 0 : index
    %32 = vector.load %arg6[%c0_25, %c0_26] : memref<2x32xf32, #tpu.memory_space<vmem>>, vector<2x32xf32>
    tpu.vector_store %arg6[%c0_25, %c0_26], %31 {strides = array<i32>} : memref<2x32xf32, #tpu.memory_space<vmem>>, vector<2x32xf32>,
    return
  }
}

module attributes {stable_mosaic.version = 11 : i64} {
  func.func @_cpool_kernel(%arg0: i32, %arg1: memref<2x16x256xf32, #tpu.memory_space<vmem>>, %arg2: memref<1x2x16xf32, #tpu.memory_space<vmem>>, %arg3: memref<2x256xf32, #tpu.memory_space<vmem>>, %arg4: memref<2x256xf32, #tpu.memory_space<vmem>>) attributes {dimension_semantics = [#tpu.dimension_semantics<arbitrary>], iteration_bounds = array<i64: 2>, scalar_prefetch = 0 : i64, scratch_operands = 0 : i64, tpu.core_type = #tpu.core_type<tc>, window_params = [{transform_indices = @transform_0, window_bounds = array<i64: 2, 16, 256>}, {transform_indices = @transform_1, window_bounds = array<i64: 1, 2, 16>}, {pipeline_mode = #tpu.pipeline_mode<synchronous>, transform_indices = @transform_2, window_bounds = array<i64: 2, 256>}, {pipeline_mode = #tpu.pipeline_mode<synchronous>, transform_indices = @transform_3, window_bounds = array<i64: 2, 256>}]} {
    %c0 = arith.constant 0 : index
    %c0_0 = arith.constant 0 : index
    %c0_1 = arith.constant 0 : index
    %0 = vector.load %arg1[%c0, %c0_0, %c0_1] : memref<2x16x256xf32, #tpu.memory_space<vmem>>, vector<2x16x256xf32>
    %c0_2 = arith.constant 0 : index
    %c0_3 = arith.constant 0 : index
    %c0_4 = arith.constant 0 : index
    %1 = vector.load %arg2[%c0_2, %c0_3, %c0_4] : memref<1x2x16xf32, #tpu.memory_space<vmem>>, vector<1x2x16xf32>
    %2 = vector.shape_cast %1 : vector<1x2x16xf32> to vector<2x16xf32>
    %3 = vector.shape_cast %2 : vector<2x16xf32> to vector<2x16x1xf32>
    %4 = vector.broadcast %3 : vector<2x16x1xf32> to vector<2x16x256xf32>
    %5 = arith.mulf %0, %4 : vector<2x16x256xf32>
    %cst = arith.constant dense<0xFF800000> : vector<2x256xf32>
    %6 = vector.multi_reduction <maximumf>, %5, %cst [1] : vector<2x16x256xf32> to vector<2x256xf32>
    %cst_5 = arith.constant dense<0.000000e+00> : vector<2x256xf32>
    %7 = vector.multi_reduction <add>, %5, %cst_5 [1] : vector<2x16x256xf32> to vector<2x256xf32>
    %c0_i32 = arith.constant 0 : i32
    %8 = arith.cmpi eq, %arg0, %c0_i32 : i32
    %9 = arith.extui %8 : i1 to i32
    %c0_i32_6 = arith.constant 0 : i32
    %10 = arith.cmpi ne, %9, %c0_i32_6 : i32
    scf.if %10 {
      %c0_10 = arith.constant 0 : index
      %c0_11 = arith.constant 0 : index
      %17 = vector.load %arg3[%c0_10, %c0_11] : memref<2x256xf32, #tpu.memory_space<vmem>>, vector<2x256xf32>
      tpu.vector_store %arg3[%c0_10, %c0_11], %6 {strides = array<i32>} : memref<2x256xf32, #tpu.memory_space<vmem>>, vector<2x256xf32>,
      %c0_12 = arith.constant 0 : index
      %c0_13 = arith.constant 0 : index
      %18 = vector.load %arg4[%c0_12, %c0_13] : memref<2x256xf32, #tpu.memory_space<vmem>>, vector<2x256xf32>
      tpu.vector_store %arg4[%c0_12, %c0_13], %7 {strides = array<i32>} : memref<2x256xf32, #tpu.memory_space<vmem>>, vector<2x256xf32>,
    } else {
    }
    %c0_i32_7 = arith.constant 0 : i32
    %11 = arith.cmpi sgt, %arg0, %c0_i32_7 : i32
    %12 = arith.extui %11 : i1 to i32
    %c0_i32_8 = arith.constant 0 : i32
    %13 = arith.cmpi ne, %12, %c0_i32_8 : i32
    scf.if %13 {
      %c0_10 = arith.constant 0 : index
      %c0_11 = arith.constant 0 : index
      %17 = vector.load %arg3[%c0_10, %c0_11] : memref<2x256xf32, #tpu.memory_space<vmem>>, vector<2x256xf32>
      %18 = arith.maximumf %17, %6 : vector<2x256xf32>
      %c0_12 = arith.constant 0 : index
      %c0_13 = arith.constant 0 : index
      %19 = vector.load %arg3[%c0_12, %c0_13] : memref<2x256xf32, #tpu.memory_space<vmem>>, vector<2x256xf32>
      tpu.vector_store %arg3[%c0_12, %c0_13], %18 {strides = array<i32>} : memref<2x256xf32, #tpu.memory_space<vmem>>, vector<2x256xf32>,
      %c0_14 = arith.constant 0 : index
      %c0_15 = arith.constant 0 : index
      %20 = vector.load %arg4[%c0_14, %c0_15] : memref<2x256xf32, #tpu.memory_space<vmem>>, vector<2x256xf32>
      %21 = arith.addf %20, %7 : vector<2x256xf32>
      %c0_16 = arith.constant 0 : index
      %c0_17 = arith.constant 0 : index
      %22 = vector.load %arg4[%c0_16, %c0_17] : memref<2x256xf32, #tpu.memory_space<vmem>>, vector<2x256xf32>
      tpu.vector_store %arg4[%c0_16, %c0_17], %21 {strides = array<i32>} : memref<2x256xf32, #tpu.memory_space<vmem>>, vector<2x256xf32>,
    } else {
    }
    %c1_i32 = arith.constant 1 : i32
    %14 = arith.cmpi eq, %arg0, %c1_i32 : i32
    %15 = arith.extui %14 : i1 to i32
    %c0_i32_9 = arith.constant 0 : i32
    %16 = arith.cmpi ne, %15, %c0_i32_9 : i32
    scf.if %16 {
      %c0_10 = arith.constant 0 : index
      %c0_11 = arith.constant 0 : index
      %17 = vector.load %arg4[%c0_10, %c0_11] : memref<2x256xf32, #tpu.memory_space<vmem>>, vector<2x256xf32>
      %cst_12 = arith.constant 3.125000e-02 : f32
      %18 = vector.broadcast %cst_12 : f32 to vector<2x256xf32>
      %19 = arith.mulf %17, %18 : vector<2x256xf32>
      %c0_13 = arith.constant 0 : index
      %c0_14 = arith.constant 0 : index
      %20 = vector.load %arg4[%c0_13, %c0_14] : memref<2x256xf32, #tpu.memory_space<vmem>>, vector<2x256xf32>
      tpu.vector_store %arg4[%c0_13, %c0_14], %19 {strides = array<i32>} : memref<2x256xf32, #tpu.memory_space<vmem>>, vector<2x256xf32>,
    } else {
    }
    return
  }
  func.func @transform_0(%arg0: i32) -> (i32, i32, i32) {
    %c0_i32 = arith.constant 0 : i32
    %c0_i32_0 = arith.constant 0 : i32
    %c0_i32_1 = arith.constant 0 : i32
    return %c0_i32, %arg0, %c0_i32_0 : i32, i32, i32
  }
  func.func @transform_1(%arg0: i32) -> (i32, i32, i32) {
    %c0_i32 = arith.constant 0 : i32
    %c0_i32_0 = arith.constant 0 : i32
    %c0_i32_1 = arith.constant 0 : i32
    return %arg0, %c0_i32, %c0_i32_0 : i32, i32, i32
  }
  func.func @transform_2(%arg0: i32) -> (i32, i32) {
    %c0_i32 = arith.constant 0 : i32
    %c0_i32_0 = arith.constant 0 : i32
    %c0_i32_1 = arith.constant 0 : i32
    return %c0_i32, %c0_i32_0 : i32, i32
  }
  func.func @transform_3(%arg0: i32) -> (i32, i32) {
    %c0_i32 = arith.constant 0 : i32
    %c0_i32_0 = arith.constant 0 : i32
    %c0_i32_1 = arith.constant 0 : i32
    return %c0_i32, %c0_i32_0 : i32, i32
  }
}

module attributes {stable_mosaic.version = 11 : i64} {
  func.func @_sa_kernel(%arg0: memref<2x16x16xf32, #tpu.memory_space<vmem>>, %arg1: memref<2x16x16xf32, #tpu.memory_space<vmem>>, %arg2: memref<7x16x16xbf16, #tpu.memory_space<vmem>>, %arg3: memref<7x16x16xbf16, #tpu.memory_space<vmem>>, %arg4: memref<2xf32, #tpu.memory_space<smem>>, %arg5: memref<2x16x16xf32, #tpu.memory_space<vmem>>, %arg6: memref<2x22x16xf32, #tpu.memory_space<vmem>>, %arg7: memref<2x22x16xf32, #tpu.memory_space<vmem>>) attributes {dimension_semantics = [], scalar_prefetch = 0 : i64, scratch_operands = 2 : i64, tpu.core_type = #tpu.core_type<tc>} {
    %cst = arith.constant 0.000000e+00 : f32
    %0 = vector.broadcast %cst : f32 to vector<2x22x16xf32>
    %c0 = arith.constant 0 : index
    %c0_0 = arith.constant 0 : index
    %c0_1 = arith.constant 0 : index
    %1 = vector.load %arg6[%c0, %c0_0, %c0_1] : memref<2x22x16xf32, #tpu.memory_space<vmem>>, vector<2x22x16xf32>
    tpu.vector_store %arg6[%c0, %c0_0, %c0_1], %0 {strides = array<i32>} : memref<2x22x16xf32, #tpu.memory_space<vmem>>, vector<2x22x16xf32>,
    %cst_2 = arith.constant 0.000000e+00 : f32
    %2 = vector.broadcast %cst_2 : f32 to vector<2x22x16xf32>
    %c0_3 = arith.constant 0 : index
    %c0_4 = arith.constant 0 : index
    %c0_5 = arith.constant 0 : index
    %3 = vector.load %arg7[%c0_3, %c0_4, %c0_5] : memref<2x22x16xf32, #tpu.memory_space<vmem>>, vector<2x22x16xf32>
    tpu.vector_store %arg7[%c0_3, %c0_4, %c0_5], %2 {strides = array<i32>} : memref<2x22x16xf32, #tpu.memory_space<vmem>>, vector<2x22x16xf32>,
    %c0_6 = arith.constant 0 : index
    %c0_7 = arith.constant 0 : index
    %c0_8 = arith.constant 0 : index
    %4 = vector.load %arg0[%c0_6, %c0_7, %c0_8] : memref<2x16x16xf32, #tpu.memory_space<vmem>>, vector<2x16x16xf32>
    %c0_9 = arith.constant 0 : index
    %c3 = arith.constant 3 : index
    %c0_10 = arith.constant 0 : index
    %5 = vector.load %arg6[%c0_9, %c3, %c0_10] : memref<2x22x16xf32, #tpu.memory_space<vmem>>, vector<2x16x16xf32>
    tpu.vector_store %arg6[%c0_9, %c3, %c0_10], %4 {strides = array<i32>} : memref<2x22x16xf32, #tpu.memory_space<vmem>>, vector<2x16x16xf32>,
    %c0_11 = arith.constant 0 : index
    %c0_12 = arith.constant 0 : index
    %c0_13 = arith.constant 0 : index
    %6 = vector.load %arg1[%c0_11, %c0_12, %c0_13] : memref<2x16x16xf32, #tpu.memory_space<vmem>>, vector<2x16x16xf32>
    %c0_14 = arith.constant 0 : index
    %c3_15 = arith.constant 3 : index
    %c0_16 = arith.constant 0 : index
    %7 = vector.load %arg7[%c0_14, %c3_15, %c0_16] : memref<2x22x16xf32, #tpu.memory_space<vmem>>, vector<2x16x16xf32>
    tpu.vector_store %arg7[%c0_14, %c3_15, %c0_16], %6 {strides = array<i32>} : memref<2x22x16xf32, #tpu.memory_space<vmem>>, vector<2x16x16xf32>,
    %cst_17 = arith.constant 0.000000e+00 : f32
    %8 = vector.broadcast %cst_17 : f32 to vector<32x16xf32>
    %c0_18 = arith.constant 0 : index
    %c0_19 = arith.constant 0 : index
    %c0_20 = arith.constant 0 : index
    %9 = vector.load %arg6[%c0_18, %c0_19, %c0_20] : memref<2x22x16xf32, #tpu.memory_space<vmem>>, vector<2x16x16xf32>
    %10 = vector.shape_cast %9 : vector<2x16x16xf32> to vector<32x16xf32>
    %11 = arith.truncf %10 : vector<32x16xf32> to vector<32x16xbf16>
    %c0_21 = arith.constant 0 : index
    %c0_22 = arith.constant 0 : index
    %c0_23 = arith.constant 0 : index
    %12 = vector.load %arg7[%c0_21, %c0_22, %c0_23] : memref<2x22x16xf32, #tpu.memory_space<vmem>>, vector<2x16x16xf32>
    %13 = vector.shape_cast %12 : vector<2x16x16xf32> to vector<32x16xf32>
    %14 = arith.truncf %13 : vector<32x16xf32> to vector<32x16xbf16>
    %c0_24 = arith.constant 0 : index
    %c0_25 = arith.constant 0 : index
    %c0_26 = arith.constant 0 : index
    %15 = vector.load %arg2[%c0_24, %c0_25, %c0_26] : memref<7x16x16xbf16, #tpu.memory_space<vmem>>, vector<1x16x16xbf16>
    %16 = vector.shape_cast %15 : vector<1x16x16xbf16> to vector<16x16xbf16>
    %cst_27 = arith.constant dense<0.000000e+00> : vector<32x16xf32>
    %17 = tpu.matmul %11, %16, %cst_27 {dimension_numbers = #tpu.dot_dimension_numbers<[1], [0], [0], [1], [0, 0, 1, 1], [], []>} : vector<32x16xbf16>, vector<16x16xbf16>, vector<32x16xf32> -> vector<32x16xf32>
    %18 = arith.addf %8, %17 : vector<32x16xf32>
    %c0_28 = arith.constant 0 : index
    %c0_29 = arith.constant 0 : index
    %c0_30 = arith.constant 0 : index
    %19 = vector.load %arg3[%c0_28, %c0_29, %c0_30] : memref<7x16x16xbf16, #tpu.memory_space<vmem>>, vector<1x16x16xbf16>
    %20 = vector.shape_cast %19 : vector<1x16x16xbf16> to vector<16x16xbf16>
    %cst_31 = arith.constant dense<0.000000e+00> : vector<32x16xf32>
    %21 = tpu.matmul %14, %20, %cst_31 {dimension_numbers = #tpu.dot_dimension_numbers<[1], [0], [0], [1], [0, 0, 1, 1], [], []>} : vector<32x16xbf16>, vector<16x16xbf16>, vector<32x16xf32> -> vector<32x16xf32>
    %22 = arith.addf %18, %21 : vector<32x16xf32>
    %c0_32 = arith.constant 0 : index
    %c1 = arith.constant 1 : index
    %c0_33 = arith.constant 0 : index
    %23 = vector.load %arg6[%c0_32, %c1, %c0_33] : memref<2x22x16xf32, #tpu.memory_space<vmem>>, vector<2x16x16xf32>
    %24 = vector.shape_cast %23 : vector<2x16x16xf32> to vector<32x16xf32>
    %25 = arith.truncf %24 : vector<32x16xf32> to vector<32x16xbf16>
    %c0_34 = arith.constant 0 : index
    %c1_35 = arith.constant 1 : index
    %c0_36 = arith.constant 0 : index
    %26 = vector.load %arg7[%c0_34, %c1_35, %c0_36] : memref<2x22x16xf32, #tpu.memory_space<vmem>>, vector<2x16x16xf32>
    %27 = vector.shape_cast %26 : vector<2x16x16xf32> to vector<32x16xf32>
    %28 = arith.truncf %27 : vector<32x16xf32> to vector<32x16xbf16>
    %c1_37 = arith.constant 1 : index
    %c0_38 = arith.constant 0 : index
    %c0_39 = arith.constant 0 : index
    %29 = vector.load %arg2[%c1_37, %c0_38, %c0_39] : memref<7x16x16xbf16, #tpu.memory_space<vmem>>, vector<1x16x16xbf16>
    %30 = vector.shape_cast %29 : vector<1x16x16xbf16> to vector<16x16xbf16>
    %cst_40 = arith.constant dense<0.000000e+00> : vector<32x16xf32>
    %31 = tpu.matmul %25, %30, %cst_40 {dimension_numbers = #tpu.dot_dimension_numbers<[1], [0], [0], [1], [0, 0, 1, 1], [], []>} : vector<32x16xbf16>, vector<16x16xbf16>, vector<32x16xf32> -> vector<32x16xf32>
    %32 = arith.addf %22, %31 : vector<32x16xf32>
    %c1_41 = arith.constant 1 : index
    %c0_42 = arith.constant 0 : index
    %c0_43 = arith.constant 0 : index
    %33 = vector.load %arg3[%c1_41, %c0_42, %c0_43] : memref<7x16x16xbf16, #tpu.memory_space<vmem>>, vector<1x16x16xbf16>
    %34 = vector.shape_cast %33 : vector<1x16x16xbf16> to vector<16x16xbf16>
    %cst_44 = arith.constant dense<0.000000e+00> : vector<32x16xf32>
    %35 = tpu.matmul %28, %34, %cst_44 {dimension_numbers = #tpu.dot_dimension_numbers<[1], [0], [0], [1], [0, 0, 1, 1], [], []>} : vector<32x16xbf16>, vector<16x16xbf16>, vector<32x16xf32> -> vector<32x16xf32>
    %36 = arith.addf %32, %35 : vector<32x16xf32>
    %c0_45 = arith.constant 0 : index
    %c2 = arith.constant 2 : index
    %c0_46 = arith.constant 0 : index
    %37 = vector.load %arg6[%c0_45, %c2, %c0_46] : memref<2x22x16xf32, #tpu.memory_space<vmem>>, vector<2x16x16xf32>
    %38 = vector.shape_cast %37 : vector<2x16x16xf32> to vector<32x16xf32>
    %39 = arith.truncf %38 : vector<32x16xf32> to vector<32x16xbf16>
    %c0_47 = arith.constant 0 : index
    %c2_48 = arith.constant 2 : index
    %c0_49 = arith.constant 0 : index
    %40 = vector.load %arg7[%c0_47, %c2_48, %c0_49] : memref<2x22x16xf32, #tpu.memory_space<vmem>>, vector<2x16x16xf32>
    %41 = vector.shape_cast %40 : vector<2x16x16xf32> to vector<32x16xf32>
    %42 = arith.truncf %41 : vector<32x16xf32> to vector<32x16xbf16>
    %c2_50 = arith.constant 2 : index
    %c0_51 = arith.constant 0 : index
    %c0_52 = arith.constant 0 : index
    %43 = vector.load %arg2[%c2_50, %c0_51, %c0_52] : memref<7x16x16xbf16, #tpu.memory_space<vmem>>, vector<1x16x16xbf16>
    %44 = vector.shape_cast %43 : vector<1x16x16xbf16> to vector<16x16xbf16>
    %cst_53 = arith.constant dense<0.000000e+00> : vector<32x16xf32>
    %45 = tpu.matmul %39, %44, %cst_53 {dimension_numbers = #tpu.dot_dimension_numbers<[1], [0], [0], [1], [0, 0, 1, 1], [], []>} : vector<32x16xbf16>, vector<16x16xbf16>, vector<32x16xf32> -> vector<32x16xf32>
    %46 = arith.addf %36, %45 : vector<32x16xf32>
    %c2_54 = arith.constant 2 : index
    %c0_55 = arith.constant 0 : index
    %c0_56 = arith.constant 0 : index
    %47 = vector.load %arg3[%c2_54, %c0_55, %c0_56] : memref<7x16x16xbf16, #tpu.memory_space<vmem>>, vector<1x16x16xbf16>
    %48 = vector.shape_cast %47 : vector<1x16x16xbf16> to vector<16x16xbf16>
    %cst_57 = arith.constant dense<0.000000e+00> : vector<32x16xf32>
    %49 = tpu.matmul %42, %48, %cst_57 {dimension_numbers = #tpu.dot_dimension_numbers<[1], [0], [0], [1], [0, 0, 1, 1], [], []>} : vector<32x16xbf16>, vector<16x16xbf16>, vector<32x16xf32> -> vector<32x16xf32>
    %50 = arith.addf %46, %49 : vector<32x16xf32>
    %c0_58 = arith.constant 0 : index
    %c3_59 = arith.constant 3 : index
    %c0_60 = arith.constant 0 : index
    %51 = vector.load %arg6[%c0_58, %c3_59, %c0_60] : memref<2x22x16xf32, #tpu.memory_space<vmem>>, vector<2x16x16xf32>
    %52 = vector.shape_cast %51 : vector<2x16x16xf32> to vector<32x16xf32>
    %53 = arith.truncf %52 : vector<32x16xf32> to vector<32x16xbf16>
    %c0_61 = arith.constant 0 : index
    %c3_62 = arith.constant 3 : index
    %c0_63 = arith.constant 0 : index
    %54 = vector.load %arg7[%c0_61, %c3_62, %c0_63] : memref<2x22x16xf32, #tpu.memory_space<vmem>>, vector<2x16x16xf32>
    %55 = vector.shape_cast %54 : vector<2x16x16xf32> to vector<32x16xf32>
    %56 = arith.truncf %55 : vector<32x16xf32> to vector<32x16xbf16>
    %c3_64 = arith.constant 3 : index
    %c0_65 = arith.constant 0 : index
    %c0_66 = arith.constant 0 : index
    %57 = vector.load %arg2[%c3_64, %c0_65, %c0_66] : memref<7x16x16xbf16, #tpu.memory_space<vmem>>, vector<1x16x16xbf16>
    %58 = vector.shape_cast %57 : vector<1x16x16xbf16> to vector<16x16xbf16>
    %cst_67 = arith.constant dense<0.000000e+00> : vector<32x16xf32>
    %59 = tpu.matmul %53, %58, %cst_67 {dimension_numbers = #tpu.dot_dimension_numbers<[1], [0], [0], [1], [0, 0, 1, 1], [], []>} : vector<32x16xbf16>, vector<16x16xbf16>, vector<32x16xf32> -> vector<32x16xf32>
    %60 = arith.addf %50, %59 : vector<32x16xf32>
    %c3_68 = arith.constant 3 : index
    %c0_69 = arith.constant 0 : index
    %c0_70 = arith.constant 0 : index
    %61 = vector.load %arg3[%c3_68, %c0_69, %c0_70] : memref<7x16x16xbf16, #tpu.memory_space<vmem>>, vector<1x16x16xbf16>
    %62 = vector.shape_cast %61 : vector<1x16x16xbf16> to vector<16x16xbf16>
    %cst_71 = arith.constant dense<0.000000e+00> : vector<32x16xf32>
    %63 = tpu.matmul %56, %62, %cst_71 {dimension_numbers = #tpu.dot_dimension_numbers<[1], [0], [0], [1], [0, 0, 1, 1], [], []>} : vector<32x16xbf16>, vector<16x16xbf16>, vector<32x16xf32> -> vector<32x16xf32>
    %64 = arith.addf %60, %63 : vector<32x16xf32>
    %c0_72 = arith.constant 0 : index
    %c4 = arith.constant 4 : index
    %c0_73 = arith.constant 0 : index
    %65 = vector.load %arg6[%c0_72, %c4, %c0_73] : memref<2x22x16xf32, #tpu.memory_space<vmem>>, vector<2x16x16xf32>
    %66 = vector.shape_cast %65 : vector<2x16x16xf32> to vector<32x16xf32>
    %67 = arith.truncf %66 : vector<32x16xf32> to vector<32x16xbf16>
    %c0_74 = arith.constant 0 : index
    %c4_75 = arith.constant 4 : index
    %c0_76 = arith.constant 0 : index
    %68 = vector.load %arg7[%c0_74, %c4_75, %c0_76] : memref<2x22x16xf32, #tpu.memory_space<vmem>>, vector<2x16x16xf32>
    %69 = vector.shape_cast %68 : vector<2x16x16xf32> to vector<32x16xf32>
    %70 = arith.truncf %69 : vector<32x16xf32> to vector<32x16xbf16>
    %c4_77 = arith.constant 4 : index
    %c0_78 = arith.constant 0 : index
    %c0_79 = arith.constant 0 : index
    %71 = vector.load %arg2[%c4_77, %c0_78, %c0_79] : memref<7x16x16xbf16, #tpu.memory_space<vmem>>, vector<1x16x16xbf16>
    %72 = vector.shape_cast %71 : vector<1x16x16xbf16> to vector<16x16xbf16>
    %cst_80 = arith.constant dense<0.000000e+00> : vector<32x16xf32>
    %73 = tpu.matmul %67, %72, %cst_80 {dimension_numbers = #tpu.dot_dimension_numbers<[1], [0], [0], [1], [0, 0, 1, 1], [], []>} : vector<32x16xbf16>, vector<16x16xbf16>, vector<32x16xf32> -> vector<32x16xf32>
    %74 = arith.addf %64, %73 : vector<32x16xf32>
    %c4_81 = arith.constant 4 : index
    %c0_82 = arith.constant 0 : index
    %c0_83 = arith.constant 0 : index
    %75 = vector.load %arg3[%c4_81, %c0_82, %c0_83] : memref<7x16x16xbf16, #tpu.memory_space<vmem>>, vector<1x16x16xbf16>
    %76 = vector.shape_cast %75 : vector<1x16x16xbf16> to vector<16x16xbf16>
    %cst_84 = arith.constant dense<0.000000e+00> : vector<32x16xf32>
    %77 = tpu.matmul %70, %76, %cst_84 {dimension_numbers = #tpu.dot_dimension_numbers<[1], [0], [0], [1], [0, 0, 1, 1], [], []>} : vector<32x16xbf16>, vector<16x16xbf16>, vector<32x16xf32> -> vector<32x16xf32>
    %78 = arith.addf %74, %77 : vector<32x16xf32>
    %c0_85 = arith.constant 0 : index
    %c5 = arith.constant 5 : index
    %c0_86 = arith.constant 0 : index
    %79 = vector.load %arg6[%c0_85, %c5, %c0_86] : memref<2x22x16xf32, #tpu.memory_space<vmem>>, vector<2x16x16xf32>
    %80 = vector.shape_cast %79 : vector<2x16x16xf32> to vector<32x16xf32>
    %81 = arith.truncf %80 : vector<32x16xf32> to vector<32x16xbf16>
    %c0_87 = arith.constant 0 : index
    %c5_88 = arith.constant 5 : index
    %c0_89 = arith.constant 0 : index
    %82 = vector.load %arg7[%c0_87, %c5_88, %c0_89] : memref<2x22x16xf32, #tpu.memory_space<vmem>>, vector<2x16x16xf32>
    %83 = vector.shape_cast %82 : vector<2x16x16xf32> to vector<32x16xf32>
    %84 = arith.truncf %83 : vector<32x16xf32> to vector<32x16xbf16>
    %c5_90 = arith.constant 5 : index
    %c0_91 = arith.constant 0 : index
    %c0_92 = arith.constant 0 : index
    %85 = vector.load %arg2[%c5_90, %c0_91, %c0_92] : memref<7x16x16xbf16, #tpu.memory_space<vmem>>, vector<1x16x16xbf16>
    %86 = vector.shape_cast %85 : vector<1x16x16xbf16> to vector<16x16xbf16>
    %cst_93 = arith.constant dense<0.000000e+00> : vector<32x16xf32>
    %87 = tpu.matmul %81, %86, %cst_93 {dimension_numbers = #tpu.dot_dimension_numbers<[1], [0], [0], [1], [0, 0, 1, 1], [], []>} : vector<32x16xbf16>, vector<16x16xbf16>, vector<32x16xf32> -> vector<32x16xf32>
    %88 = arith.addf %78, %87 : vector<32x16xf32>
    %c5_94 = arith.constant 5 : index
    %c0_95 = arith.constant 0 : index
    %c0_96 = arith.constant 0 : index
    %89 = vector.load %arg3[%c5_94, %c0_95, %c0_96] : memref<7x16x16xbf16, #tpu.memory_space<vmem>>, vector<1x16x16xbf16>
    %90 = vector.shape_cast %89 : vector<1x16x16xbf16> to vector<16x16xbf16>
    %cst_97 = arith.constant dense<0.000000e+00> : vector<32x16xf32>
    %91 = tpu.matmul %84, %90, %cst_97 {dimension_numbers = #tpu.dot_dimension_numbers<[1], [0], [0], [1], [0, 0, 1, 1], [], []>} : vector<32x16xbf16>, vector<16x16xbf16>, vector<32x16xf32> -> vector<32x16xf32>
    %92 = arith.addf %88, %91 : vector<32x16xf32>
    %c0_98 = arith.constant 0 : index
    %c6 = arith.constant 6 : index
    %c0_99 = arith.constant 0 : index
    %93 = vector.load %arg6[%c0_98, %c6, %c0_99] : memref<2x22x16xf32, #tpu.memory_space<vmem>>, vector<2x16x16xf32>
    %94 = vector.shape_cast %93 : vector<2x16x16xf32> to vector<32x16xf32>
    %95 = arith.truncf %94 : vector<32x16xf32> to vector<32x16xbf16>
    %c0_100 = arith.constant 0 : index
    %c6_101 = arith.constant 6 : index
    %c0_102 = arith.constant 0 : index
    %96 = vector.load %arg7[%c0_100, %c6_101, %c0_102] : memref<2x22x16xf32, #tpu.memory_space<vmem>>, vector<2x16x16xf32>
    %97 = vector.shape_cast %96 : vector<2x16x16xf32> to vector<32x16xf32>
    %98 = arith.truncf %97 : vector<32x16xf32> to vector<32x16xbf16>
    %c6_103 = arith.constant 6 : index
    %c0_104 = arith.constant 0 : index
    %c0_105 = arith.constant 0 : index
    %99 = vector.load %arg2[%c6_103, %c0_104, %c0_105] : memref<7x16x16xbf16, #tpu.memory_space<vmem>>, vector<1x16x16xbf16>
    %100 = vector.shape_cast %99 : vector<1x16x16xbf16> to vector<16x16xbf16>
    %cst_106 = arith.constant dense<0.000000e+00> : vector<32x16xf32>
    %101 = tpu.matmul %95, %100, %cst_106 {dimension_numbers = #tpu.dot_dimension_numbers<[1], [0], [0], [1], [0, 0, 1, 1], [], []>} : vector<32x16xbf16>, vector<16x16xbf16>, vector<32x16xf32> -> vector<32x16xf32>
    %102 = arith.addf %92, %101 : vector<32x16xf32>
    %c6_107 = arith.constant 6 : index
    %c0_108 = arith.constant 0 : index
    %c0_109 = arith.constant 0 : index
    %103 = vector.load %arg3[%c6_107, %c0_108, %c0_109] : memref<7x16x16xbf16, #tpu.memory_space<vmem>>, vector<1x16x16xbf16>
    %104 = vector.shape_cast %103 : vector<1x16x16xbf16> to vector<16x16xbf16>
    %cst_110 = arith.constant dense<0.000000e+00> : vector<32x16xf32>
    %105 = tpu.matmul %98, %104, %cst_110 {dimension_numbers = #tpu.dot_dimension_numbers<[1], [0], [0], [1], [0, 0, 1, 1], [], []>} : vector<32x16xbf16>, vector<16x16xbf16>, vector<32x16xf32> -> vector<32x16xf32>
    %106 = arith.addf %102, %105 : vector<32x16xf32>
    %107 = vector.shape_cast %106 : vector<32x16xf32> to vector<1x32x16xf32>
    %cst_111 = arith.constant dense<0.000000e+00> : vector<1xf32>
    %108 = vector.multi_reduction <add>, %107, %cst_111 [1, 2] : vector<1x32x16xf32> to vector<1xf32>
    %109 = vector.shape_cast %108 : vector<1xf32> to vector<1x1x1xf32>
    %110 = vector.extract %109[0, 0, 0] : f32 from vector<1x1x1xf32>
    %cst_112 = arith.constant 5.120000e+02 : f32
    %111 = arith.divf %110, %cst_112 : f32
    %112 = vector.broadcast %111 : f32 to vector<32x16xf32>
    %113 = arith.subf %106, %112 : vector<32x16xf32>
    %114 = arith.mulf %113, %113 : vector<32x16xf32>
    %115 = vector.shape_cast %114 : vector<32x16xf32> to vector<1x32x16xf32>
    %cst_113 = arith.constant dense<0.000000e+00> : vector<1xf32>
    %116 = vector.multi_reduction <add>, %115, %cst_113 [1, 2] : vector<1x32x16xf32> to vector<1xf32>
    %117 = vector.shape_cast %116 : vector<1xf32> to vector<1x1x1xf32>
    %118 = vector.extract %117[0, 0, 0] : f32 from vector<1x1x1xf32>
    %cst_114 = arith.constant 5.120000e+02 : f32
    %119 = arith.divf %118, %cst_114 : f32
    %120 = vector.broadcast %111 : f32 to vector<32x16xf32>
    %121 = arith.subf %106, %120 : vector<32x16xf32>
    %cst_115 = arith.constant 9.99999974E-6 : f32
    %122 = arith.addf %119, %cst_115 : f32
    %123 = math.rsqrt %122 : f32
    %124 = vector.broadcast %123 : f32 to vector<32x16xf32>
    %125 = arith.mulf %121, %124 : vector<32x16xf32>
    %c0_116 = arith.constant 0 : index
    %126 = memref.load %arg4[%c0_116] : memref<2xf32, #tpu.memory_space<smem>>
    %127 = vector.broadcast %126 : f32 to vector<32x16xf32>
    %128 = arith.mulf %125, %127 : vector<32x16xf32>
    %c1_117 = arith.constant 1 : index
    %129 = memref.load %arg4[%c1_117] : memref<2xf32, #tpu.memory_space<smem>>
    %130 = vector.broadcast %129 : f32 to vector<32x16xf32>
    %131 = arith.addf %128, %130 : vector<32x16xf32>
    %132 = arith.negf %131 : vector<32x16xf32>
    %133 = math.exp %132 : vector<32x16xf32>
    %cst_118 = arith.constant 1.000000e+00 : f32
    %134 = vector.broadcast %cst_118 : f32 to vector<32x16xf32>
    %135 = arith.addf %134, %133 : vector<32x16xf32>
    %136 = arith.divf %134, %135 : vector<32x16xf32>
    %137 = vector.shape_cast %136 : vector<32x16xf32> to vector<2x16x16xf32>
    %c0_119 = arith.constant 0 : index
    %c0_120 = arith.constant 0 : index
    %c0_121 = arith.constant 0 : index
    %138 = vector.load %arg5[%c0_119, %c0_120, %c0_121] : memref<2x16x16xf32, #tpu.memory_space<vmem>>, vector<2x16x16xf32>
    tpu.vector_store %arg5[%c0_119, %c0_120, %c0_121], %137 {strides = array<i32>} : memref<2x16x16xf32, #tpu.memory_space<vmem>>, vector<2x16x16xf32>,
    return
  }
}

module attributes {stable_mosaic.version = 11 : i64} {
  func.func @_gate_kernel(%arg0: i32, %arg1: memref<2x16x256xf32, #tpu.memory_space<vmem>>, %arg2: memref<1x2x16xf32, #tpu.memory_space<vmem>>, %arg3: memref<2x256xf32, #tpu.memory_space<vmem>>, %arg4: memref<2x16x256xf32, #tpu.memory_space<vmem>>) attributes {dimension_semantics = [#tpu.dimension_semantics<parallel>], iteration_bounds = array<i64: 2>, scalar_prefetch = 0 : i64, scratch_operands = 0 : i64, tpu.core_type = #tpu.core_type<tc>, window_params = [{transform_indices = @transform_0, window_bounds = array<i64: 2, 16, 256>}, {transform_indices = @transform_1, window_bounds = array<i64: 1, 2, 16>}, {pipeline_mode = #tpu.pipeline_mode<synchronous>, transform_indices = @transform_2, window_bounds = array<i64: 2, 256>}, {transform_indices = @transform_3, window_bounds = array<i64: 2, 16, 256>}]} {
    %c0 = arith.constant 0 : index
    %c0_0 = arith.constant 0 : index
    %c0_1 = arith.constant 0 : index
    %0 = vector.load %arg1[%c0, %c0_0, %c0_1] : memref<2x16x256xf32, #tpu.memory_space<vmem>>, vector<2x16x256xf32>
    %c0_2 = arith.constant 0 : index
    %c0_3 = arith.constant 0 : index
    %c0_4 = arith.constant 0 : index
    %1 = vector.load %arg2[%c0_2, %c0_3, %c0_4] : memref<1x2x16xf32, #tpu.memory_space<vmem>>, vector<1x2x16xf32>
    %2 = vector.shape_cast %1 : vector<1x2x16xf32> to vector<2x16xf32>
    %3 = vector.shape_cast %2 : vector<2x16xf32> to vector<2x16x1xf32>
    %c0_5 = arith.constant 0 : index
    %c0_6 = arith.constant 0 : index
    %4 = vector.load %arg3[%c0_5, %c0_6] : memref<2x256xf32, #tpu.memory_space<vmem>>, vector<2x256xf32>
    %5 = vector.shape_cast %4 : vector<2x256xf32> to vector<2x1x256xf32>
    %6 = vector.broadcast %3 : vector<2x16x1xf32> to vector<2x16x256xf32>
    %7 = vector.broadcast %5 : vector<2x1x256xf32> to vector<2x16x256xf32>
    %8 = arith.mulf %6, %7 : vector<2x16x256xf32>
    %9 = arith.mulf %0, %8 : vector<2x16x256xf32>
    %c0_7 = arith.constant 0 : index
    %c0_8 = arith.constant 0 : index
    %c0_9 = arith.constant 0 : index
    %10 = vector.load %arg4[%c0_7, %c0_8, %c0_9] : memref<2x16x256xf32, #tpu.memory_space<vmem>>, vector<2x16x256xf32>
    tpu.vector_store %arg4[%c0_7, %c0_8, %c0_9], %9 {strides = array<i32>} : memref<2x16x256xf32, #tpu.memory_space<vmem>>, vector<2x16x256xf32>,
    return
  }
  func.func @transform_0(%arg0: i32) -> (i32, i32, i32) {
    %c0_i32 = arith.constant 0 : i32
    %c0_i32_0 = arith.constant 0 : i32
    %c0_i32_1 = arith.constant 0 : i32
    return %c0_i32, %arg0, %c0_i32_0 : i32, i32, i32
  }
  func.func @transform_1(%arg0: i32) -> (i32, i32, i32) {
    %c0_i32 = arith.constant 0 : i32
    %c0_i32_0 = arith.constant 0 : i32
    %c0_i32_1 = arith.constant 0 : i32
    return %arg0, %c0_i32, %c0_i32_0 : i32, i32, i32
  }
  func.func @transform_2(%arg0: i32) -> (i32, i32) {
    %c0_i32 = arith.constant 0 : i32
    %c0_i32_0 = arith.constant 0 : i32
    %c0_i32_1 = arith.constant 0 : i32
    return %c0_i32, %c0_i32_0 : i32, i32
  }
  func.func @transform_3(%arg0: i32) -> (i32, i32, i32) {
    %c0_i32 = arith.constant 0 : i32
    %c0_i32_0 = arith.constant 0 : i32
    %c0_i32_1 = arith.constant 0 : i32
    return %c0_i32, %arg0, %c0_i32_0 : i32, i32, i32
  }
}

</mosaic_0001>

<bundles_post_ra>
// kernel: cbam_forward.6
= control target key start
LH: loop header
LB: loop body
LE: loop exit
PB: predicated region body
PF: predicated region fallthrough
CT: control target
= control target key end

     0   :  { %vm32_vm0 = vcmask 261120   ;;  %vm66_vm1 = vcmask 1041408   ;;  %vm62_vm2 = vcmask 15360   ;;  %vm158_vm6 = vcmask 254976   ;;  %s242_s2 = inlined_call_operand.vmem [shape: f32[32,2], index: 2, kind: input, shape index: {}]   ;;  %s243_s3 = inlined_call_operand.vmem [shape: f32[1,2], index: 3, kind: input, shape index: {}]   ;;  %s244_s1 = inlined_call_operand.vmem [shape: f32[2,32], index: 1, kind: input, shape index: {}]   ;;  %s245_s0 = inlined_call_operand.vmem [shape: f32[2,32], index: 0, kind: input, shape index: {}]   ;;  %s246_s5 = inlined_call_operand.vmem [shape: f32[1,32], index: 5, kind: input, shape index: {}]   ;;  %s247_s4 = inlined_call_operand.vmem [shape: f32[2,32], index: 4, kind: input, shape index: {}]   ;;  %s248_s6 = inlined_call_operand.vmem [shape: f32[2,32], index: 6, kind: output, shape index: {}]  }
   0x1   :  { %v27_v0 = vld [vmem:[%s242_s2 + $0x18] sm:$0xff]  ;;  %v26_v1 = vld [vmem:[%s242_s2 + $0x10] sm:$0xff]  ;;  %v25_v2 = vld [vmem:[%s242_s2 + $0x8] sm:$0xff] }
   0x2   :  { %106 = vmatpush.msra.mxu2 %v27_v0  ;;  %48 = vmatpush.msra.mxu0 %v27_v0  ;;  %v24_v3 = vld [vmem:[%s242_s2] sm:$0xff] }
   0x3   :  { %v90_v4 = vld [vmem:[%s244_s1] sm:$0x3] }
   0x4   :  { %107 = vmatpush.msra.mxu2 %v26_v1  ;;  %49 = vmatpush.msra.mxu0 %v26_v1  ;;  %v23_v5 = vld [vmem:[%s245_s0] sm:$0x3] }
   0x5   :  { %v57_v6 = vld [vmem:[%s247_s4] sm:$0x3] }
   0x6   :  { %108 = vmatpush.msra.mxu2 %v25_v2  ;;  %50 = vmatpush.msra.mxu0 %v25_v2  ;;  %v171_v7 = vld [vmem:[%s243_s3] ss:$0 sm:$0xff] }
   0x7   :  { %168 = vmatpush.msk.msra.mxu3 %vm66_vm1, %v57_v6  ;;  %165 = vmatpush.msk.msra.mxu1 %vm66_vm1, %v57_v6  ;;  %v172_v14 = vld [vmem:[%s246_s5] ss:$0 sm:$0xff] }
   0x8   :  { %109 = vmatpush.msra.mxu2 %v24_v3  ;;  %51 = vmatpush.msra.mxu0 %v24_v3 }
   0x9   :  { %167 = vmatmul.msk.f32.vlgmr.msra.gmra.mxu2 %vm32_vm0, %v90_v4  ;;  %164 = vmatmul.msk.f32.vlgmr.msra.gmra.mxu0 %vm32_vm0, %v23_v5 }
  0x86   :  { %v53_v8 = vpop.f32.mrf.mxu0 }
  0x87   :  { %v54_v9 = vadd.f32 %v171_v7, %v53_v8 }
  0x89   :  { %v56_v10 = vmax.f32 %v54_v9, 0.0 }
  0x8b   :  { %166 = vmatmul.msk.f32.vlgmr.msra.gmra.mxu1 %vm62_vm2, %v56_v10 }
  0x8c   :  { %v111_v11 = vpop.f32.mrf.mxu2 }
  0x8d   :  { %v112_v12 = vadd.f32 %v171_v7, %v111_v11 }
  0x8f   :  { %v114_v13 = vmax.f32 %v112_v12, 0.0 }
  0x91   :  { %169 = vmatmul.msk.f32.vlgmr.msra.gmra.mxu3 %vm62_vm2, %v114_v13 }
 0x108   :  { %v87_v15 = vpop.f32.mrf.mxu1 }
 0x109   :  { %v88_v16 = vadd.f32 %v172_v14, %v87_v15 }
 0x114   :  { %v135_v17 = vpop.f32.mrf.mxu3 }
 0x115   :  { %v136_v18 = vadd.f32 %v172_v14, %v135_v17 }
 0x117   :  { %v138_v19 = vadd.f32 %v136_v18, %v88_v16 }
 0x119   :  { %v170_v20 = vmul.f32 -1.442695, %v138_v19 }
 0x11b   :  { %173 = vpow2.f32 %v170_v20 }
 0x121   :  { %v174_v21 = vpop.eup %173 }
 0x122   :  { %v142_v22 = vadd.f32 1.0, %v174_v21 }
 0x124   :  { %175 = vrcp.f32 %v142_v22  ;;  %v154_v26 = vand.u32 2147483648, %v142_v22  ;;  %v152_v28 = vand.u32 2147483647, %v142_v22  ;;  %vm148_vm4 = vweird.f32 %v142_v22 }
 0x126   :  { %v155_v30 = vor.u32 1.1754944e-38, %v154_v26  ;;  %vm153_vm7 = vcmp.eq.f32.partialorder %v152_v28, 8.507059e+37 }
 0x12a   :  { %v176_v23 = vpop.eup %175 }
 0x12b   :  { %v144_v24 = vmul.f32 %v176_v23, %v142_v22  ;;  %vm149_vm3 = vweird.f32 %v176_v23 }
 0x12c   :  { %vm150_vm5 = vmor %vm148_vm4, %vm149_vm3 }
 0x12d   :  { %v145_v25 = vsub.f32 1.0, %v144_v24 }
 0x12f   :  { %v146_v27 = vmul.f32 %v176_v23, %v145_v25 }
 0x131   :  { %v147_v29 = vadd.f32 %v176_v23, %v146_v27 }
 0x133   :  { %v151_v31 = vsel %vm150_vm5, %v176_v23, %v147_v29 }
 0x134   :  { %v156_v32 = vsel %vm153_vm7, %v155_v30, %v151_v31 }
 0x135   :  { %159 = vst.msk [vmem:[%s248_s6] sm:$0x3] %vm158_vm6, %v156_v32 }

// kernel: cbam_forward.5
= control target key start
LH: loop header
LB: loop body
LE: loop exit
PB: predicated region body
PF: predicated region fallthrough
CT: control target
= control target key end

     0   :  { %s437_s9 = smov 0   ;;  %s439_s10 = smov 0   ;;  %s503_s0 = inlined_call_operand.vmem [shape: f32[2,32,256], index: 0, kind: input, shape index: {}]   ;;  %s504_s1 = inlined_call_operand.vmem [shape: f32[2,2,16], index: 1, kind: output, shape index: {0}]   ;;  %s505_s2 = inlined_call_operand.vmem [shape: f32[2,2,16], index: 2, kind: output, shape index: {1}]  }
   0x1   :  { %s441_s11 = smov 0  }
   0x2 LB: > { %s354_s12 = sadd.s32 4294967295, %s419_s11   ;;  %s454_s13 = sadd.s32 1, %s419_s11   ;;  %s419_s11 = sphi %s441_s11, %s508_s11   ;;  %s415_s10 = sphi %s439_s10, %s507_s10   ;;  %s411_s9 = sphi %s437_s9, %s506_s9  }
   0x3   : > { %s17_s14 = ssub.s32 %s419_s11, %s454_s13  ;;  %s20_s15 = sadd.s32 1, %s415_s10 }
   0x4   : > { %p18_p0 = scmp.eq.s32.totalorder %s17_s14, 0  ;;  %p27_p1 = scmp.ne.s32.totalorder %s415_s10, %s411_s9 }
   0x5   : > { %p28_p2 = scmp.eq.s32.totalorder %s419_s11, 0  ;;  %p357_p4 = scmp.ge.s32.totalorder %s419_s11, 2 }
   0x6   : > { %s463_s16 = scalar_select %p18_p0, %s415_s10, %s20_s15  }
   0x7   : > { %p29_p3 = por %p28_p2, %p27_p1  ;;  %105 = sbr.rel (%p357_p4) target bundleno = 24 (0x18), region = 16 }
   0xc   : > { %108 = sbr.rel (!%p29_p3) target bundleno = 24 (0x18), region = 20  ;;  %s110_s17 = sand.u32 (%p29_p3), 1, %s415_s10  }
   0xd   : > { %s369_s18 = sshll.u32 (%p29_p3), %s419_s11, 5  ;;  %s358_s19 = sshll.u32 (%p29_p3), %s110_s17, 6 }
   0xe   : > { %s116_s22 = scalar_lea.vmem (%p29_p3), %s503_s0, %s369_s18  ;;  %s112_s23 = scalar_lea.vmem (%p29_p3), [#allocation2], %s358_s19 }
   0xf   : > { %v129_v0 = vld [vmem:[%s116_s22] sm:$0xff] (%p29_p3)  ;;  %v131_v1 = vld [vmem:[%s116_s22 + $0x8] sm:$0xff] (%p29_p3)  ;;  %v133_v2 = vld [vmem:[%s116_s22 + $0x10] sm:$0xff] (%p29_p3) }
  0x10   : > { %130 = vst [vmem:[%s112_s23] sm:$0xff] (%p29_p3), %v129_v0  ;;  %v135_v3 = vld [vmem:[%s116_s22 + $0x18] sm:$0xff] (%p29_p3)  ;;  %v137_v4 = vld [vmem:[%s116_s22 + $0x40] sm:$0xff] (%p29_p3)  ;;  %v139_v5 = vld [vmem:[%s116_s22 + $0x48] sm:$0xff] (%p29_p3) }
  0x11   : > { %132 = vst [vmem:[%s112_s23 + $0x8] sm:$0xff] %v131_v1  ;;  %v141_v6 = vld [vmem:[%s116_s22 + $0x50] sm:$0xff]  ;;  %v143_v7 = vld [vmem:[%s116_s22 + $0x58] sm:$0xff] }
  0x12   : > { %134 = vst [vmem:[%s112_s23 + $0x10] sm:$0xff] %v133_v2 }
  0x13   : > { %136 = vst [vmem:[%s112_s23 + $0x18] sm:$0xff] %v135_v3 }
  0x14   : > { %138 = vst [vmem:[%s112_s23 + $0x20] sm:$0xff] %v137_v4 }
  0x15   : > { %140 = vst [vmem:[%s112_s23 + $0x28] sm:$0xff] %v139_v5 }
  0x16   : > { %142 = vst [vmem:[%s112_s23 + $0x30] sm:$0xff] %v141_v6 }
  0x17   : > { %144 = vst [vmem:[%s112_s23 + $0x38] sm:$0xff] %v143_v7 }
  0x18 PF: > { %p362_p5 = scmp.ge.s32.totalorder %s419_s11, 1  ;;  %p149_p6 = scmp.lt.s32.totalorder %s419_s11, 3 }
  0x1a   : > { %p150_p7 = pnand %p362_p5, %p149_p6 }
  0x1b   : > { %s156_s24 = sand.u32 (!%p150_p7), 1, %s411_s9   ;;  %p181_p8 = scmp.lt.s32.totalorder (!%p150_p7), %s354_s12, 1 }
  0x1c   : > { %153 = sbr.rel (%p150_p7) target bundleno = 174 (0xae), region = 43  ;;  %s363_s25 = sshll.u32 (!%p150_p7), %s156_s24, 6 }
  0x1d   : > { %s158_s26 = scalar_lea.vmem (!%p150_p7), [#allocation2], %s363_s25 }
  0x21   : > { %v193_v8 = vld [vmem:[%s158_s26 + $0x20] sm:$0xff]  ;;  %v194_v9 = vld [vmem:[%s158_s26 + $0x28] sm:$0xff]  ;;  %v195_v15 = vld [vmem:[%s158_s26 + $0x30] sm:$0xff]  ;;  %v421_v24 = vmov 256.0   ;;  %v224_v32 = vlaneseq  ;;  %s510_s12 = smov (!%p181_p8, %s354_s12), 1  ;;  %vm229_vm1 = vcmask 130112  }
  0x22   : > { %v189_v10 = vld [vmem:[%s158_s26] sm:$0xff]  ;;  %v203_v11 = vadd.f32 %v194_v9, %v193_v8  ;;  %v190_v12 = vld [vmem:[%s158_s26 + $0x8] sm:$0xff]  ;;  %v196_v16 = vld [vmem:[%s158_s26 + $0x38] sm:$0xff]  ;;  %v245_v23 = vmax.f32 %v193_v8, %v194_v9  ;;  %395 = vrcp.f32 %v421_v24  ;;  %s364_s27 = sshll.u32 %s510_s12, 1  ;;  %vm234_vm2 = vcmask 1041409  }
  0x23   : > { %v239_v13 = vmax.f32 %v189_v10, %v190_v12  ;;  %v197_v14 = vadd.f32 %v190_v12, %v189_v10  ;;  %v191_v17 = vld [vmem:[%s158_s26 + $0x10] sm:$0xff]  ;;  %v192_v18 = vld [vmem:[%s158_s26 + $0x18] sm:$0xff]  ;;  %v206_v19 = vadd.f32 %v196_v16, %v195_v15  ;;  %v248_v22 = vmax.f32 %v195_v15, %v196_v16  ;;  %s184_s30 = scalar_lea.vmem %s504_s1, %s364_s27  ;;  %s188_s5 = scalar_lea.vmem %s505_s2, %s364_s27 }
  0x24   : > { %204 = vadd.xlane.f32.xlu1 %v203_v11  ;;  %v242_v20 = vmax.f32 %v191_v17, %v192_v18  ;;  %v200_v21 = vadd.f32 %v192_v18, %v191_v17  ;;  %v225_v35 = vand.u32 127, %v224_v32  ;;  %vm237_vm3 = vcmask 123904  }
  0x25   : > { %240 = vmax.xlane.f32.xlu2 %v239_v13  ;;  %198 = vadd.xlane.f32.xlu0 %v197_v14 }
  0x26   : > { %v227_v39 = vadd.s32 4294967288, %v225_v35 }
  0x28   : > { %v396_v25 = vpop.eup %395 }
  0x29   : > { %v210_v26 = vmul.f32 256.0, %v396_v25  ;;  %vm214_vm0 = vweird.f32 %v396_v25 }
  0x2b   : > { %v211_v27 = vsub.f32 1.0, %v210_v26 }
  0x2c   : > { %207 = vadd.xlane.f32.xlu1 %v206_v19 }
  0x2d   : > { %243 = vmax.xlane.f32.xlu2 %v242_v20  ;;  %201 = vadd.xlane.f32.xlu0 %v200_v21  ;;  %v212_v28 = vmul.f32 %v396_v25, %v211_v27 }
  0x2f   : > { %v213_v29 = vadd.f32 %v396_v25, %v212_v28 }
  0x31   : > { %v215_v34 = vsel %vm214_vm0, %v396_v25, %v213_v29 }
  0x34   : > { %249 = vmax.xlane.f32.xlu1 %v248_v22 }
  0x35   : > { %246 = vmax.xlane.f32.xlu0 %v245_v23 }
  0x97   : > { %v205_v30 = vpop.xlane.xlu1 %204 }
  0x98   : > { %v199_v31 = vpop.xlane.xlu0 %198  ;;  %v241_v33 = vpop.xlane.xlu2 %240  ;;  %v218_v36 = vmul.f32 %v215_v34, %v205_v30 }
  0x99   : > { %v216_v37 = vmul.f32 %v215_v34, %v199_v31  ;;  %v255_v51 = vperm.slane %v241_v33, %v225_v35 }
  0x9a   : > { %v231_v43 = vperm.slane %v218_v36, %v225_v35 }
  0x9b   : > { %v226_v45 = vperm.slane %v216_v37, %v225_v35 }
  0x9f   : > { %v208_v38 = vpop.xlane.xlu1 %207 }
  0xa0   : > { %v219_v40 = vmul.f32 %v215_v34, %v208_v38  ;;  %v202_v41 = vpop.xlane.xlu0 %201  ;;  %v244_v48 = vpop.xlane.xlu2 %243 }
  0xa1   : > { %v217_v42 = vmul.f32 %v215_v34, %v202_v41  ;;  %v256_v52 = vperm.slane %v244_v48, %v227_v39 }
  0xa2   : > { %v232_v44 = vperm.slane %v219_v40, %v227_v39 }
  0xa3   : > { %v228_v46 = vperm.slane %v217_v42, %v227_v39  ;;  %v257_v57 = vsel %vm229_vm1, %v256_v52, %v255_v51 }
  0xa4   : > { %v233_v47 = vsel %vm229_vm1, %v232_v44, %v231_v43 }
  0xa5   : > { %v230_v49 = vsel %vm229_vm1, %v228_v46, %v226_v45 }
  0xa6   : > { %v235_v50 = vsel %vm234_vm2, %v233_v47, %v230_v49 }
  0xa7   : > { %238 = vst.msk [vmem:[%s184_s30] sm:$0x3] %vm237_vm3, %v235_v50  ;;  %v250_v53 = vpop.xlane.xlu1 %249 }
  0xa8   : > { %v259_v54 = vperm.slane %v250_v53, %v227_v39  ;;  %v247_v55 = vpop.xlane.xlu0 %246 }
  0xa9   : > { %v258_v56 = vperm.slane %v247_v55, %v225_v35 }
  0xab   : > { %v260_v58 = vsel %vm229_vm1, %v259_v54, %v258_v56 }
  0xac   : > { %v261_v59 = vsel %vm234_vm2, %v260_v58, %v257_v57 }
  0xad   : > { %263 = vst.msk [vmem:[%s188_s5] sm:$0x3] %vm237_vm3, %v261_v59 }
  0xae PF: > { %p10_p9 = scmp.ge.s32.totalorder %s454_s13, 4   ;;  %s506_s9 = smov %s415_s10 }
  0xaf   : > { %s507_s10 = smov %s463_s16  ;;  %s508_s11 = smov %s454_s13 }
  0xb0   :  { %12 = sbr.rel (!%p10_p9) target bundleno = 2 (0x2), region = 94 }

// kernel: cbam_forward.7
= control target key start
LH: loop header
LB: loop body
LE: loop exit
PB: predicated region body
PF: predicated region fallthrough
CT: control target
= control target key end

     0   :  { %s548_s12 = smov 0   ;;  %s550_s13 = smov 0   ;;  %s629_s0 = inlined_call_operand.vmem [shape: f32[2,32,256], index: 0, kind: input, shape index: {}]   ;;  %s630_s1 = inlined_call_operand.vmem [shape: f32[2,2,16], index: 1, kind: input, shape index: {}]   ;;  %s631_s2 = inlined_call_operand.vmem [shape: f32[2,256], index: 2, kind: output, shape index: {0}]   ;;  %s632_s3 = inlined_call_operand.vmem [shape: f32[2,256], index: 3, kind: output, shape index: {1}]  }
   0x1   :  { %s552_s14 = smov 0  }
   0x2 LB: > { %s564_s15 = sadd.s32 4294967295, %s526_s14   ;;  %s567_s16 = sadd.s32 1, %s526_s14   ;;  %s526_s14 = sphi %s552_s14, %s635_s14   ;;  %s522_s13 = sphi %s550_s13, %s634_s13   ;;  %s518_s12 = sphi %s548_s12, %s633_s12  }
   0x3   : > { %s18_s17 = ssub.s32 %s526_s14, %s567_s16  ;;  %s21_s18 = sadd.s32 1, %s522_s13 }
   0x4   : > { %p19_p0 = scmp.eq.s32.totalorder %s18_s17, 0  ;;  %p28_p1 = scmp.ne.s32.totalorder %s522_s13, %s518_s12 }
   0x5   : > { %p29_p2 = scmp.eq.s32.totalorder %s526_s14, 0  ;;  %p461_p4 = scmp.ge.s32.totalorder %s526_s14, 2 }
   0x6   : > { %s576_s19 = scalar_select %p19_p0, %s522_s13, %s21_s18  }
   0x7   : > { %p30_p3 = por %p29_p2, %p28_p1  ;;  %122 = sbr.rel (%p461_p4) target bundleno = 24 (0x18), region = 16 }
   0xc   : > { %125 = sbr.rel (!%p30_p3) target bundleno = 24 (0x18), region = 20  ;;  %s127_s20 = sand.u32 (%p30_p3), 1, %s522_s13  }
   0xd   : > { %s475_s21 = sshll.u32 (%p30_p3), %s526_s14, 5  ;;  %s462_s22 = sshll.u32 (%p30_p3), %s127_s20, 6 }
   0xe   : > { %s133_s25 = scalar_lea.vmem (%p30_p3), %s629_s0, %s475_s21  ;;  %s129_s26 = scalar_lea.vmem (%p30_p3), [#allocation2], %s462_s22 }
   0xf   : > { %v146_v0 = vld [vmem:[%s133_s25] sm:$0xff] (%p30_p3)  ;;  %v148_v1 = vld [vmem:[%s133_s25 + $0x8] sm:$0xff] (%p30_p3)  ;;  %v150_v2 = vld [vmem:[%s133_s25 + $0x10] sm:$0xff] (%p30_p3) }
  0x10   : > { %147 = vst [vmem:[%s129_s26] sm:$0xff] (%p30_p3), %v146_v0  ;;  %v152_v3 = vld [vmem:[%s133_s25 + $0x18] sm:$0xff] (%p30_p3)  ;;  %v154_v4 = vld [vmem:[%s133_s25 + $0x40] sm:$0xff] (%p30_p3)  ;;  %v156_v5 = vld [vmem:[%s133_s25 + $0x48] sm:$0xff] (%p30_p3) }
  0x11   : > { %149 = vst [vmem:[%s129_s26 + $0x8] sm:$0xff] %v148_v1  ;;  %v158_v6 = vld [vmem:[%s133_s25 + $0x50] sm:$0xff]  ;;  %v160_v7 = vld [vmem:[%s133_s25 + $0x58] sm:$0xff] }
  0x12   : > { %151 = vst [vmem:[%s129_s26 + $0x10] sm:$0xff] %v150_v2 }
  0x13   : > { %153 = vst [vmem:[%s129_s26 + $0x18] sm:$0xff] %v152_v3 }
  0x14   : > { %155 = vst [vmem:[%s129_s26 + $0x20] sm:$0xff] %v154_v4 }
  0x15   : > { %157 = vst [vmem:[%s129_s26 + $0x28] sm:$0xff] %v156_v5 }
  0x16   : > { %159 = vst [vmem:[%s129_s26 + $0x30] sm:$0xff] %v158_v6 }
  0x17   : > { %161 = vst [vmem:[%s129_s26 + $0x38] sm:$0xff] %v160_v7 }
  0x18 PF: > { %p466_p5 = scmp.ge.s32.totalorder %s526_s14, 1  ;;  %p173_p6 = scmp.lt.s32.totalorder %s526_s14, 3 }
  0x1a   : > { %p174_p7 = pnand %p466_p5, %p173_p6 }
  0x1b   : > { %p203_p8 = scmp.lt.s32.totalorder (!%p174_p7), %s564_s15, 1  ;;  %s180_s5 = sand.u32 (!%p174_p7), 1, %s518_s12  }
  0x1c   : > { %177 = sbr.rel (%p174_p7) target bundleno = 234 (0xea), region = 47  ;;  %s467_s6 = sshll.u32 (!%p174_p7), %s180_s5, 6 }
  0x1d   : > { %s182_s7 = scalar_lea.vmem (!%p174_p7), [#allocation2], %s467_s6  ;;  %p469_p9 = scmp.ne.s32.totalorder (!%p174_p7), %s564_s15, 0 }
  0x21   : > { %v217_v8 = vlaneseq  ;;  %s204_s27 = scalar_select %p203_p8, %s564_s15, 1  ;;  %v211_v16 = vld [vmem:[%s182_s7 + $0x20] sm:$0xff]  ;;  %v212_v17 = vld [vmem:[%s182_s7 + $0x28] sm:$0xff]  ;;  %v213_v18 = vld [vmem:[%s182_s7 + $0x30] sm:$0xff] }
  0x22   : > { %v214_v19 = vld [vmem:[%s182_s7 + $0x38] sm:$0xff]  ;;  %v209_v20 = vld [vmem:[%s182_s7 + $0x10] sm:$0xff]  ;;  %v207_v22 = vld [vmem:[%s182_s7] sm:$0xff] }
  0x23   : > { %v218_v9 = vshrl.u32 %v217_v8, 7  ;;  %s468_s28 = sshll.u32 %s204_s27, 1  ;;  %v210_v21 = vld [vmem:[%s182_s7 + $0x18] sm:$0xff]  ;;  %v208_v23 = vld [vmem:[%s182_s7 + $0x8] sm:$0xff] }
  0x24   : > { %s206_s4 = scalar_lea.vmem %s630_s1, %s468_s28 }
  0x25   : > { %502 = vset.pattern.permute.xlu1 %v218_v9  ;;  %500 = vset.pattern.permute.xlu0 %v218_v9  ;;  %v215_v10 = vld [vmem:[%s206_s4] sm:$0x3]  ;;  %v225_v13 = vadd.s32 8, %v218_v9 }
  0x26   : > { %v229_v11 = vperm.slane %v215_v10, 1  ;;  %v216_v12 = vperm.slane %v215_v10, 0 }
  0x2d   : > { %234 = vperm.xlu1 %502, %v229_v11   ;;  %221 = vperm.xlu0 %500, %v216_v12  }
  0x35   : > { %503 = vset.pattern.permute.xlu1 %v225_v13  ;;  %501 = vset.pattern.permute.xlu0 %v225_v13 }
  0x3d   : > { %240 = vperm.xlu1 %503, %v229_v11   ;;  %227 = vperm.xlu0 %501, %v216_v12  }
  0x9f   : > { %v235_v14 = vpop.permute.xlu1 %234  ;;  %v222_v15 = vpop.permute.xlu0 %221 }
  0xa0   : > { %v246_v24 = vmul.f32 %v235_v14, %v211_v16  ;;  %v247_v25 = vmul.f32 %v235_v14, %v212_v17  ;;  %v242_v32 = vmul.f32 %v222_v15, %v207_v22  ;;  %v243_v33 = vmul.f32 %v222_v15, %v208_v23 }
  0xaf   : > { %v241_v26 = vpop.permute.xlu1 %240  ;;  %v228_v27 = vpop.permute.xlu0 %227 }
  0xb0   : > { %v248_v28 = vmul.f32 %v241_v26, %v213_v18  ;;  %v249_v29 = vmul.f32 %v241_v26, %v214_v19  ;;  %v244_v30 = vmul.f32 %v228_v27, %v209_v20  ;;  %v245_v31 = vmul.f32 %v228_v27, %v210_v21 }
  0xb2   : > { %v264_v34 = vmax.f32 %v246_v24, %v248_v28  ;;  %v271_v35 = vmax.f32 %v247_v25, %v249_v29  ;;  %v292_v36 = vadd.f32 %v248_v28, %v246_v24  ;;  %v299_v37 = vadd.f32 %v249_v29, %v247_v25 }
  0xb3   : > { %v250_v38 = vmax.f32 %v242_v32, %v244_v30  ;;  %v257_v39 = vmax.f32 %v243_v33, %v245_v31  ;;  %v278_v40 = vadd.f32 %v244_v30, %v242_v32  ;;  %v285_v41 = vadd.f32 %v245_v31, %v243_v33 }
  0xb4   : > { %v265_v42 = vrot.slane %v264_v34, 4  ;;  %v272_v43 = vrot.slane %v271_v35, 4  ;;  %v293_v44 = vrot.slane %v292_v36, 4  ;;  %v300_v45 = vrot.slane %v299_v37, 4 }
  0xb5   : > { %v251_v46 = vrot.slane %v250_v38, 4  ;;  %v258_v47 = vrot.slane %v257_v39, 4  ;;  %v279_v48 = vrot.slane %v278_v40, 4  ;;  %v286_v49 = vrot.slane %v285_v41, 4 }
  0xb6   : > { %v266_v50 = vmax.f32 %v264_v34, %v265_v42  ;;  %v273_v51 = vmax.f32 %v271_v35, %v272_v43  ;;  %v294_v52 = vadd.f32 %v293_v44, %v292_v36  ;;  %v301_v53 = vadd.f32 %v300_v45, %v299_v37 }
  0xb7   : > { %v252_v54 = vmax.f32 %v250_v38, %v251_v46  ;;  %v259_v55 = vmax.f32 %v257_v39, %v258_v47  ;;  %v280_v56 = vadd.f32 %v279_v48, %v278_v40  ;;  %v287_v57 = vadd.f32 %v286_v49, %v285_v41 }
  0xb8   : > { %v267_v58 = vrot.slane %v266_v50, 2  ;;  %v274_v59 = vrot.slane %v273_v51, 2  ;;  %v295_v60 = vrot.slane %v294_v52, 2  ;;  %v302_v61 = vrot.slane %v301_v53, 2 }
  0xb9   : > { %v253_v62 = vrot.slane %v252_v54, 2  ;;  %v260_v63 = vrot.slane %v259_v55, 2  ;;  %v281_v0 = vrot.slane %v280_v56, 2  ;;  %v288_v1 = vrot.slane %v287_v57, 2 }
  0xba   : > { %v268_v2 = vmax.f32 %v266_v50, %v267_v58  ;;  %v275_v3 = vmax.f32 %v273_v51, %v274_v59  ;;  %v296_v4 = vadd.f32 %v295_v60, %v294_v52  ;;  %v303_v5 = vadd.f32 %v302_v61, %v301_v53 }
  0xbb   : > { %v254_v6 = vmax.f32 %v252_v54, %v253_v62  ;;  %v261_v7 = vmax.f32 %v259_v55, %v260_v63  ;;  %v282_v8 = vadd.f32 %v281_v0, %v280_v56  ;;  %v289_v9 = vadd.f32 %v288_v1, %v287_v57  ;;  %309 = sbr.rel (%p469_p9) target bundleno = 203 (0xcb), region = 55 }
  0xbc   : > { %v269_v10 = vrot.slane %v268_v2, 1  ;;  %v276_v11 = vrot.slane %v275_v3, 1  ;;  %v297_v12 = vrot.slane %v296_v4, 1  ;;  %v304_v13 = vrot.slane %v303_v5, 1 }
  0xbd   : > { %v255_v14 = vrot.slane %v254_v6, 1  ;;  %v262_v15 = vrot.slane %v261_v7, 1  ;;  %v283_v16 = vrot.slane %v282_v8, 1  ;;  %v290_v17 = vrot.slane %v289_v9, 1 }
  0xbe   : > { %v270_v18 = vmax.f32 %v268_v2, %v269_v10  ;;  %v277_v19 = vmax.f32 %v275_v3, %v276_v11  ;;  %v298_v20 = vadd.f32 %v297_v12, %v296_v4  ;;  %v305_v21 = vadd.f32 %v304_v13, %v303_v5 }
  0xbf   : > { %v256_v22 = vmax.f32 %v254_v6, %v255_v14  ;;  %v263_v23 = vmax.f32 %v261_v7, %v262_v15  ;;  %v284_v24 = vadd.f32 %v283_v16, %v282_v8  ;;  %v291_v25 = vadd.f32 %v290_v17, %v289_v9 }
  0xc0   : > { %v315_v27 = vrot.slane %v277_v19, 6  ;;  %vm316_vm0 = vcmask 1041408   ;;  %vm324_vm1 = vcmask 1041409   ;;  %v339_v31 = vrot.slane %v305_v21, 6 }
  0xc1   : > { %v314_v26 = vrot.slane %v263_v23, 6  ;;  %v338_v28 = vrot.slane %v291_v25, 6  ;;  %vm326_vm2 = vcmask 1043459   ;;  %vm328_vm3 = vcmask 1045509  }
  0xc2   : > { %v318_v30 = vsel %vm316_vm0, %v270_v18, %v315_v27  ;;  %v341_v34 = vsel %vm316_vm0, %v298_v20, %v339_v31  ;;  %vm330_vm4 = vcmask 1047559  }
  0xc3   : > { %v317_v29 = vsel %vm316_vm0, %v256_v22, %v314_v26  ;;  %v323_v32 = vrot.slane %v318_v30, 7  ;;  %v340_v33 = vsel %vm316_vm0, %v284_v24, %v338_v28  ;;  %v344_v36 = vrot.slane %v341_v34, 7 }
  0xc5   : > { %v325_v35 = vsel %vm324_vm1, %v323_v32, %v317_v29  ;;  %v345_v39 = vsel %vm324_vm1, %v344_v36, %v340_v33 }
  0xc6   : > { %v327_v37 = vsel %vm326_vm2, %v323_v32, %v325_v35  ;;  %v346_v41 = vsel %vm326_vm2, %v344_v36, %v345_v39 }
  0xc7   : > { %v329_v38 = vsel %vm328_vm3, %v323_v32, %v327_v37  ;;  %v347_v42 = vsel %vm328_vm3, %v344_v36, %v346_v41 }
  0xc8   : > { %v331_v40 = vsel %vm330_vm4, %v323_v32, %v329_v38  ;;  %v348_v43 = vsel %vm330_vm4, %v344_v36, %v347_v42 }
  0xc9   : > { %333 = vst [vmem:[%s631_s2] sm:$0xf] %v331_v40 }
  0xca   : > { %350 = vst [vmem:[%s632_s3] sm:$0xf] %v348_v43 }
  0xcb PF: > { %p470_p10 = scmp.le.s32.totalorder %s564_s15, 0 }
  0xcd   : > { %354 = sbr.rel (%p470_p10) target bundleno = 223 (0xdf), region = 59 }
  0xd2   : > { %v360_v44 = vrot.slane %v263_v23, 6  ;;  %v361_v45 = vrot.slane %v277_v19, 6  ;;  %vm362_vm5 = vcmask 1041408   ;;  %v386_v46 = vrot.slane %v291_v25, 6  ;;  %v355_v55 = vld [vmem:[%s631_s2] sm:$0xf] }
  0xd3   : > { %vm370_vm6 = vcmask 1041409   ;;  %v387_v49 = vrot.slane %v305_v21, 6  ;;  %vm372_vm7 = vcmask 1043459   ;;  %vm374_vm8 = vcmask 1045509   ;;  %v381_v60 = vld [vmem:[%s632_s3] sm:$0xf] }
  0xd4   : > { %v363_v47 = vsel %vm362_vm5, %v256_v22, %v360_v44  ;;  %v364_v48 = vsel %vm362_vm5, %v270_v18, %v361_v45  ;;  %v388_v51 = vsel %vm362_vm5, %v284_v24, %v386_v46  ;;  %vm376_vm9 = vcmask 1047559  }
  0xd5   : > { %v369_v50 = vrot.slane %v364_v48, 7  ;;  %v389_v52 = vsel %vm362_vm5, %v298_v20, %v387_v49 }
  0xd6   : > { %v392_v54 = vrot.slane %v389_v52, 7 }
  0xd7   : > { %v371_v53 = vsel %vm370_vm6, %v369_v50, %v363_v47 }
  0xd8   : > { %v373_v56 = vsel %vm372_vm7, %v369_v50, %v371_v53  ;;  %v393_v58 = vsel %vm370_vm6, %v392_v54, %v388_v51 }
  0xd9   : > { %v375_v57 = vsel %vm374_vm8, %v369_v50, %v373_v56  ;;  %v394_v61 = vsel %vm372_vm7, %v392_v54, %v393_v58 }
  0xda   : > { %v377_v59 = vsel %vm376_vm9, %v369_v50, %v375_v57  ;;  %v395_v63 = vsel %vm374_vm8, %v392_v54, %v394_v61 }
  0xdb   : > { %v379_v62 = vmax.f32 %v355_v55, %v377_v59  ;;  %v396_v0 = vsel %vm376_vm9, %v392_v54, %v395_v63 }
  0xdc   : > { %v398_v1 = vadd.f32 %v396_v0, %v381_v60 }
  0xdd   : > { %380 = vst [vmem:[%s631_s2] sm:$0xf] %v379_v62 }
  0xde   : > { %399 = vst [vmem:[%s632_s3] sm:$0xf] %v398_v1 }
  0xdf PF: > { %p471_p11 = scmp.ne.s32.totalorder %s564_s15, 1 }
  0xe1   : > { %403 = sbr.rel (%p471_p11) target bundleno = 234 (0xea), region = 63 }
  0xe6   : > { %v404_v2 = vld [vmem:[%s632_s3] sm:$0xf] }
  0xe7   : > { %v405_v3 = vmul.f32 0.03125, %v404_v2 }
  0xe9   : > { %406 = vst [vmem:[%s632_s3] sm:$0xf] %v405_v3 }
  0xea PF: > { %p11_p12 = scmp.ge.s32.totalorder %s567_s16, 4   ;;  %s633_s12 = smov %s522_s13 }
  0xeb   : > { %s634_s13 = smov %s576_s19  ;;  %s635_s14 = smov %s567_s16 }
  0xec   :  { %13 = sbr.rel (!%p11_p12) target bundleno = 2 (0x2), region = 105 }

// kernel: cbam_forward.9
= control target key start
LH: loop header
LB: loop body
LE: loop exit
PB: predicated region body
PF: predicated region fallthrough
CT: control target
= control target key end

     0   :  { %s508_s12 = smov 0   ;;  %s510_s13 = smov 0   ;;  %s594_s0 = inlined_call_operand.vmem [shape: f32[2,32,256], index: 0, kind: input, shape index: {}]   ;;  %s595_s1 = inlined_call_operand.vmem [shape: f32[2,2,16], index: 1, kind: input, shape index: {}]   ;;  %s596_s2 = inlined_call_operand.vmem [shape: f32[2,256], index: 2, kind: input, shape index: {}]   ;;  %s597_s3 = inlined_call_operand.vmem [shape: f32[2,32,256], index: 3, kind: output, shape index: {}]  }
   0x1   :  { %s512_s14 = smov 0  }
   0x2 LB: > { %s524_s15 = sadd.s32 4294967295, %s486_s14   ;;  %s527_s16 = sadd.s32 1, %s486_s14   ;;  %s486_s14 = sphi %s512_s14, %s601_s14   ;;  %s482_s13 = sphi %s510_s13, %s600_s13   ;;  %s478_s12 = sphi %s508_s12, %s599_s12  }
   0x3   : > { %s17_s17 = ssub.s32 %s486_s14, %s527_s16  ;;  %s20_s18 = sadd.s32 1, %s482_s13 }
   0x4   : > { %p18_p0 = scmp.eq.s32.totalorder %s17_s17, 0  ;;  %p27_p1 = scmp.ne.s32.totalorder %s482_s13, %s478_s12 }
   0x5   : > { %p28_p2 = scmp.eq.s32.totalorder %s486_s14, 0  ;;  %p104_p3 = scmp.eq.s32.totalorder %s524_s15, 1 }
   0x6   : > { %s537_s19 = scalar_select %p18_p0, %s482_s13, %s20_s18  }
   0x7   : > { %p29_p4 = por %p28_p2, %p27_p1  ;;  %p539_p5 = por %p104_p3, %p27_p1 }
   0x8   : > { %p417_p6 = scmp.ge.s32.totalorder %s486_s14, 2 }
   0xa   : > { %129 = sbr.rel (%p417_p6) target bundleno = 27 (0x1b), region = 20 }
   0xf   : > { %132 = sbr.rel (!%p29_p4) target bundleno = 27 (0x1b), region = 24  ;;  %s134_s21 = sand.u32 (%p29_p4), 1, %s482_s13  }
  0x10   : > { %s433_s22 = sshll.u32 (%p29_p4), %s486_s14, 5  ;;  %s418_s23 = sshll.u32 (%p29_p4), %s134_s21, 6 }
  0x11   : > { %s140_s26 = scalar_lea.vmem (%p29_p4), %s594_s0, %s433_s22  ;;  %s136_s27 = scalar_lea.vmem (%p29_p4), [#allocation2], %s418_s23 }
  0x12   : > { %v153_v0 = vld [vmem:[%s140_s26] sm:$0xff] (%p29_p4)  ;;  %v155_v1 = vld [vmem:[%s140_s26 + $0x8] sm:$0xff] (%p29_p4)  ;;  %v157_v2 = vld [vmem:[%s140_s26 + $0x10] sm:$0xff] (%p29_p4) }
  0x13   : > { %154 = vst [vmem:[%s136_s27] sm:$0xff] (%p29_p4), %v153_v0  ;;  %v159_v3 = vld [vmem:[%s140_s26 + $0x18] sm:$0xff] (%p29_p4)  ;;  %v161_v4 = vld [vmem:[%s140_s26 + $0x40] sm:$0xff] (%p29_p4)  ;;  %v163_v5 = vld [vmem:[%s140_s26 + $0x48] sm:$0xff] (%p29_p4) }
  0x14   : > { %156 = vst [vmem:[%s136_s27 + $0x8] sm:$0xff] %v155_v1  ;;  %v165_v6 = vld [vmem:[%s140_s26 + $0x50] sm:$0xff]  ;;  %v167_v7 = vld [vmem:[%s140_s26 + $0x58] sm:$0xff] }
  0x15   : > { %158 = vst [vmem:[%s136_s27 + $0x10] sm:$0xff] %v157_v2 }
  0x16   : > { %160 = vst [vmem:[%s136_s27 + $0x18] sm:$0xff] %v159_v3 }
  0x17   : > { %162 = vst [vmem:[%s136_s27 + $0x20] sm:$0xff] %v161_v4 }
  0x18   : > { %164 = vst [vmem:[%s136_s27 + $0x28] sm:$0xff] %v163_v5 }
  0x19   : > { %166 = vst [vmem:[%s136_s27 + $0x30] sm:$0xff] %v165_v6 }
  0x1a   : > { %168 = vst [vmem:[%s136_s27 + $0x38] sm:$0xff] %v167_v7 }
  0x1b PF: > { %p422_p7 = scmp.ge.s32.totalorder %s486_s14, 1  ;;  %p180_p8 = scmp.lt.s32.totalorder %s486_s14, 3 }
  0x1d   : > { %p181_p9 = pnand %p422_p7, %p180_p8 }
  0x1e   : > { %p214_p10 = scmp.lt.s32.totalorder (!%p181_p9), %s524_s15, 1  ;;  %s187_s8 = sand.u32 (!%p181_p9), 1, %s478_s12  }
  0x1f   : > { %184 = sbr.rel (%p181_p9) target bundleno = 195 (0xc3), region = 51  ;;  %s423_s9 = sshll.u32 (!%p181_p9), %s187_s8, 6 }
  0x20   : > { %s189_s10 = scalar_lea.vmem (!%p181_p9), [#allocation2], %s423_s9  ;;  %s560_s11 = scalar_lea.vmem (!%p181_p9), [#allocation3], %s423_s9 }
  0x24   : > { %v229_v8 = vlaneseq  ;;  %s215_s28 = scalar_select %p214_p10, %s524_s15, 1  ;;  %v254_v14 = vld [vmem:[%s596_s2] sm:$0xf]  ;;  %vm265_vm0 = vcmask 1041409   ;;  %vm267_vm1 = vcmask 1043459   ;;  %vm269_vm2 = vcmask 1042433  }
  0x25   : > { %v256_v15 = vrot.slane %v254_v14, 1  ;;  %v257_v16 = vrot.slane %v254_v14, 2  ;;  %v258_v17 = vrot.slane %v254_v14, 3  ;;  %vm259_vm3 = vcmask 1040384   ;;  %v223_v30 = vld [vmem:[%s189_s10 + $0x20] sm:$0xff]  ;;  %v224_v31 = vld [vmem:[%s189_s10 + $0x28] sm:$0xff] }
  0x26   : > { %v230_v9 = vshrl.u32 %v229_v8, 7  ;;  %s425_s29 = sshll.u32 %s215_s28, 1  ;;  %vm261_vm4 = vcmask 1042434   ;;  %vm263_vm5 = vcmask 1041408   ;;  %v219_v33 = vld [vmem:[%s189_s10] sm:$0xff]  ;;  %v220_v36 = vld [vmem:[%s189_s10 + $0x8] sm:$0xff] }
  0x27   : > { %s217_s5 = scalar_lea.vmem %s595_s1, %s425_s29  ;;  %v266_v18 = vsel %vm265_vm0, %v254_v14, %v256_v15  ;;  %v268_v19 = vsel %vm267_vm1, %v257_v16, %v258_v17  ;;  %v260_v21 = vsel %vm259_vm3, %v254_v14, %v256_v15  ;;  %v262_v22 = vsel %vm261_vm4, %v257_v16, %v258_v17  ;;  %v225_v44 = vld [vmem:[%s189_s10 + $0x30] sm:$0xff]  ;;  %v226_v45 = vld [vmem:[%s189_s10 + $0x38] sm:$0xff]  ;;  %s435_s12 = sshll.u32 (%p539_p5), %s524_s15, 5 }
  0x28   : > { %462 = vset.pattern.permute.xlu1 %v230_v9  ;;  %460 = vset.pattern.permute.xlu0 %v230_v9  ;;  %v227_v10 = vld [vmem:[%s217_s5] sm:$0x3]  ;;  %v237_v13 = vadd.s32 8, %v230_v9  ;;  %v270_v20 = vsel %vm269_vm2, %v266_v18, %v268_v19  ;;  %v264_v24 = vsel %vm263_vm5, %v260_v21, %v262_v22  ;;  %v221_v47 = vld [vmem:[%s189_s10 + $0x10] sm:$0xff]  ;;  %v222_v50 = vld [vmem:[%s189_s10 + $0x18] sm:$0xff]  ;;  %s314_s18 = scalar_lea.vmem (%p539_p5), %s597_s3, %s435_s12 }
  0x29   : > { %v241_v11 = vperm.slane %v227_v10, 1  ;;  %v228_v12 = vperm.slane %v227_v10, 0  ;;  %v271_v23 = vrot.slane %v270_v20, 1  ;;  %v272_v27 = vperm.slane %v264_v24, 0 }
  0x2a   : > { %v273_v28 = vperm.slane %v264_v24, 1 }
  0x2b   : > { %v274_v25 = vperm.slane %v271_v23, 0  ;;  %v275_v26 = vperm.slane %v271_v23, 1 }
  0x30   : > { %246 = vperm.xlu1 %462, %v241_v11   ;;  %233 = vperm.xlu0 %460, %v228_v12  }
  0x38   : > { %463 = vset.pattern.permute.xlu1 %v237_v13  ;;  %461 = vset.pattern.permute.xlu0 %v237_v13 }
  0x40   : > { %252 = vperm.xlu1 %463, %v241_v11   ;;  %239 = vperm.xlu0 %461, %v228_v12  }
  0xa2   : > { %v247_v29 = vpop.permute.xlu1 %246  ;;  %v234_v32 = vpop.permute.xlu0 %233 }
  0xa3   : > { %v284_v34 = vmul.f32 %v274_v25, %v247_v29  ;;  %v285_v35 = vmul.f32 %v275_v26, %v247_v29  ;;  %v280_v37 = vmul.f32 %v272_v27, %v234_v32  ;;  %v281_v38 = vmul.f32 %v273_v28, %v234_v32 }
  0xa5   : > { %v292_v39 = vmul.f32 %v284_v34, %v223_v30  ;;  %v293_v40 = vmul.f32 %v285_v35, %v224_v31  ;;  %v288_v41 = vmul.f32 %v280_v37, %v219_v33  ;;  %v289_v42 = vmul.f32 %v281_v38, %v220_v36 }
  0xa7   : > { %300 = vst [vmem:[%s560_s11 + $0x20] sm:$0xff] %v292_v39 }
  0xa8   : > { %301 = vst [vmem:[%s560_s11 + $0x28] sm:$0xff] %v293_v40 }
  0xa9   : > { %296 = vst [vmem:[%s560_s11] sm:$0xff] %v288_v41 }
  0xaa   : > { %297 = vst [vmem:[%s560_s11 + $0x8] sm:$0xff] %v289_v42 }
  0xae   : > { %v335_v61 = vld [vmem:[%s560_s11 + $0x20] sm:$0xff] (%p539_p5) }
  0xaf   : > { %v337_v62 = vld [vmem:[%s560_s11 + $0x28] sm:$0xff] (%p539_p5)  ;;  %336 = vst [vmem:[%s314_s18 + $0x40] sm:$0xff] (%p539_p5), %v335_v61 }
  0xb0   : > { %v327_v57 = vld [vmem:[%s560_s11] sm:$0xff] (%p539_p5)  ;;  %338 = vst [vmem:[%s314_s18 + $0x48] sm:$0xff] (%p539_p5), %v337_v62 }
  0xb1   : > { %v329_v58 = vld [vmem:[%s560_s11 + $0x8] sm:$0xff] (%p539_p5)  ;;  %328 = vst [vmem:[%s314_s18] sm:$0xff] (%p539_p5), %v327_v57 }
  0xb2   : > { %v253_v43 = vpop.permute.xlu1 %252  ;;  %v240_v46 = vpop.permute.xlu0 %239  ;;  %330 = vst [vmem:[%s314_s18 + $0x8] sm:$0xff] (%p539_p5), %v329_v58 }
  0xb3   : > { %v286_v48 = vmul.f32 %v274_v25, %v253_v43  ;;  %v287_v49 = vmul.f32 %v275_v26, %v253_v43  ;;  %v282_v51 = vmul.f32 %v272_v27, %v240_v46  ;;  %v283_v52 = vmul.f32 %v273_v28, %v240_v46 }
  0xb5   : > { %v294_v53 = vmul.f32 %v286_v48, %v225_v44  ;;  %v295_v54 = vmul.f32 %v287_v49, %v226_v45  ;;  %v290_v55 = vmul.f32 %v282_v51, %v221_v47  ;;  %v291_v56 = vmul.f32 %v283_v52, %v222_v50 }
  0xb6   : > { %310 = sbr.rel (!%p539_p5) target bundleno = 195 (0xc3), region = 59 }
  0xb7   : > { %302 = vst [vmem:[%s560_s11 + $0x30] sm:$0xff] %v294_v53 }
  0xb8   : > { %303 = vst [vmem:[%s560_s11 + $0x38] sm:$0xff] %v295_v54 }
  0xb9   : > { %298 = vst [vmem:[%s560_s11 + $0x10] sm:$0xff] %v290_v55 }
  0xba   : > { %299 = vst [vmem:[%s560_s11 + $0x18] sm:$0xff] %v291_v56 }
  0xbe   : > { %v339_v63 = vld [vmem:[%s560_s11 + $0x30] sm:$0xff] }
  0xbf   : > { %v341_v0 = vld [vmem:[%s560_s11 + $0x38] sm:$0xff]  ;;  %340 = vst [vmem:[%s314_s18 + $0x50] sm:$0xff] %v339_v63 }
  0xc0   : > { %v331_v59 = vld [vmem:[%s560_s11 + $0x10] sm:$0xff]  ;;  %342 = vst [vmem:[%s314_s18 + $0x58] sm:$0xff] %v341_v0 }
  0xc1   : > { %v333_v60 = vld [vmem:[%s560_s11 + $0x18] sm:$0xff]  ;;  %332 = vst [vmem:[%s314_s18 + $0x10] sm:$0xff] %v331_v59 }
  0xc2   : > { %334 = vst [vmem:[%s314_s18 + $0x18] sm:$0xff] %v333_v60 }
  0xc3 PF: > { %p10_p11 = scmp.ge.s32.totalorder %s527_s16, 4   ;;  %s599_s12 = smov %s482_s13 }
  0xc4   : > { %s600_s13 = smov %s537_s19  ;;  %s601_s14 = smov %s527_s16 }
  0xc5   :  { %12 = sbr.rel (!%p10_p11) target bundleno = 2 (0x2), region = 116 }

// kernel: cbam_forward.8
= control target key start
LH: loop header
LB: loop body
LE: loop exit
PB: predicated region body
PF: predicated region fallthrough
CT: control target
= control target key end

     0   :  { %10 = vsyncpa [#allocation5], 0  ;;  %s1018_s21 = smov [#allocation4]   ;;  %s1211_s0 = inlined_call_operand.vmem [shape: f32[2,16,16], index: 0, kind: input, shape index: {}]   ;;  %s1212_s1 = inlined_call_operand.vmem [shape: f32[2,16,16], index: 1, kind: input, shape index: {}]   ;;  %s1213_s2 = inlined_call_operand.vmem [shape: bf16[7,16,16], index: 2, kind: input, shape index: {}]   ;;  %s1214_s3 = inlined_call_operand.vmem [shape: bf16[7,16,16], index: 3, kind: input, shape index: {}]   ;;  %s1215_s4 = inlined_call_operand.vmem [shape: f32[2], index: 4, kind: input, shape index: {}]   ;;  %s1216_s5 = inlined_call_operand.vmem [shape: f32[2,16,16], index: 5, kind: output, shape index: {}]  }
   0x1   :  { %s24_s20 = sshll.u32 %s1215_s4, 4  ;;  %s25_s20 = int_to_ptr.vmem [resolvable:$true] %s24_s20 }
   0x2   :  { %27 = dma.vmem_to_smem %s25_s20, 16, %s1018_s21, [#allocation5]  }
   0x3   :  { %1016 = dma.done.wait [#allocation5], 16  }
   0x4   :  { %1017 = vsyncadd [#allocation5], 4294967280 }
   0x5   :  { %32 = sfence }
   0x6   :  { %v958_v0 = vld [vmem:[%s1214_s3] sm:$0xff]  ;;  %vm34_vm0 = vcmask 130048   ;;  %vm37_vm1 = vcmask 128000   ;;  %v1019_v2 = vmov 0.0   ;;  %v58_v3 = vld [vmem:[%s1212_s1 + $0x10] sm:$0xff]  ;;  %v59_v4 = vld [vmem:[%s1212_s1 + $0x18] sm:$0xff] }
   0x7   :  { %v957_v1 = vld [vmem:[%s1213_s2] sm:$0xff]  ;;  %45 = vst.msk [vmem:[#allocation3 + $0x18] sm:$0xff] %vm34_vm0, %v1019_v2  ;;  %971 = vmatpush.bf16.msra.mxu2 %v958_v0  ;;  %v959_v5 = vld [vmem:[%s1213_s2 + $0x8] sm:$0xff]  ;;  %99 = vmatpush.bf16.msra.mxu0 %v958_v0  ;;  %v961_v7 = vld [vmem:[%s1213_s2 + $0x10] sm:$0xff]  ;;  %s747_s16 = sld [smem:[#allocation4]] }
   0x8   :  { %972 = vmatpush.bf16.msra.mxu3 %v957_v1  ;;  %46 = vst.msk [vmem:[#allocation3 + $0x20] sm:$0xff] %vm34_vm0, %v1019_v2  ;;  %130 = vmatpush.bf16.msra.mxu1 %v957_v1  ;;  %v960_v6 = vld [vmem:[%s1214_s3 + $0x8] sm:$0xff]  ;;  %v962_v8 = vld [vmem:[%s1214_s3 + $0x10] sm:$0xff]  ;;  %v963_v12 = vld [vmem:[%s1213_s2 + $0x18] sm:$0xff]  ;;  %s952_s17 = sld [smem:[#allocation4 + $0x1]] }
   0x9   :  { %47 = vst.msk [vmem:[#allocation3 + $0x28] sm:$0x3f] %vm37_vm1, %v1019_v2  ;;  %v50_v11 = vld [vmem:[%s1211_s0 + $0x10] sm:$0xff]  ;;  %v51_v14 = vld [vmem:[%s1211_s0 + $0x18] sm:$0xff]  ;;  %v56_v15 = vld [vmem:[%s1212_s1] sm:$0xff] }
   0xa   :  { %62 = vst.msk [vmem:[#allocation3 + $0x1b] sm:$0xff] %vm34_vm0, %v58_v3  ;;  %v57_v16 = vld [vmem:[%s1212_s1 + $0x8] sm:$0xff]  ;;  %v48_v17 = vld [vmem:[%s1211_s0] sm:$0xff]  ;;  %v964_v21 = vld [vmem:[%s1214_s3 + $0x18] sm:$0xff] }
   0xb   :  { %176 = vmatpush.bf16.msrb.mxu2 %v959_v5  ;;  %63 = vst.msk [vmem:[#allocation3 + $0x23] sm:$0xff] %vm34_vm0, %v59_v4  ;;  %264 = vmatpush.bf16.msrb.mxu0 %v961_v7  ;;  %v49_v18 = vld [vmem:[%s1211_s0 + $0x8] sm:$0xff]  ;;  %v965_v25 = vld [vmem:[%s1213_s2 + $0x20] sm:$0xff]  ;;  %v969_v48 = vld [vmem:[%s1213_s2 + $0x30] sm:$0xff] }
   0xc   :  { %214 = vmatpush.bf16.msrb.mxu3 %v960_v6  ;;  %35 = vst.msk [vmem:[#allocation2] sm:$0xff] %vm34_vm0, %v1019_v2  ;;  %302 = vmatpush.bf16.msrb.mxu1 %v962_v8  ;;  %v966_v31 = vld [vmem:[%s1214_s3 + $0x20] sm:$0xff]  ;;  %v967_v45 = vld [vmem:[%s1213_s2 + $0x28] sm:$0xff]  ;;  %v970_v49 = vld [vmem:[%s1214_s3 + $0x30] sm:$0xff] }
   0xd   :  { %36 = vst.msk [vmem:[#allocation2 + $0x8] sm:$0xff] %vm34_vm0, %v1019_v2  ;;  %v968_v47 = vld [vmem:[%s1214_s3 + $0x28] sm:$0xff] }
   0xe   :  { %38 = vst.msk [vmem:[#allocation2 + $0x10] sm:$0x3f] %vm37_vm1, %v1019_v2 }
   0xf   :  { %39 = vst.msk [vmem:[#allocation2 + $0x18] sm:$0xff] %vm34_vm0, %v1019_v2 }
  0x10   :  { %40 = vst.msk [vmem:[#allocation2 + $0x20] sm:$0xff] %vm34_vm0, %v1019_v2 }
  0x11   :  { %v72_v9 = vld [vmem:[#allocation3 + $0x18] sm:$0xff]  ;;  %41 = vst.msk [vmem:[#allocation2 + $0x28] sm:$0x3f] %vm37_vm1, %v1019_v2 }
  0x12   :  { %v73_v10 = vld [vmem:[#allocation3 + $0x20] sm:$0xff]  ;;  %42 = vst.msk [vmem:[#allocation3] sm:$0xff] %vm34_vm0, %v1019_v2 }
  0x13   :  { %v75_v13 = vpack.c.bf16 %v73_v10, %v72_v9  ;;  %43 = vst.msk [vmem:[#allocation3 + $0x8] sm:$0xff] %vm34_vm0, %v1019_v2  ;;  %v150_v50 = vld [vmem:[#allocation3 + $0x19] sm:$0xff]  ;;  %v151_v51 = vld [vmem:[#allocation3 + $0x21] sm:$0xff] }
  0x14   :  { %44 = vst.msk [vmem:[#allocation3 + $0x10] sm:$0x3f] %vm37_vm1, %v1019_v2  ;;  %v153_v54 = vpack.c.bf16 %v151_v51, %v150_v50  ;;  %v238_v55 = vld [vmem:[#allocation3 + $0x1a] sm:$0xff]  ;;  %v239_v56 = vld [vmem:[#allocation3 + $0x22] sm:$0xff] }
  0x15   :  { %849 = vmatmul.msk.bf16.vlgmr.msra.gmra.mxu2 %vm34_vm0, %v75_v13  ;;  %54 = vst.msk [vmem:[#allocation2 + $0x1b] sm:$0xff] %vm34_vm0, %v50_v11  ;;  %v241_v60 = vpack.c.bf16 %v239_v56, %v238_v55  ;;  %v326_v10 = vld [vmem:[#allocation3 + $0x1b] sm:$0xff]  ;;  %v327_v11 = vld [vmem:[#allocation3 + $0x23] sm:$0xff] }
  0x16   :  { %55 = vst.msk [vmem:[#allocation2 + $0x23] sm:$0xff] %vm34_vm0, %v51_v14  ;;  %352 = vmatpush.bf16.msra.mxu2 %v963_v12  ;;  %v329_v14 = vpack.c.bf16 %v327_v11, %v326_v10 }
  0x17   :  { %60 = vst.msk [vmem:[#allocation3 + $0x3] sm:$0xff] %vm34_vm0, %v56_v15  ;;  %v414_v15 = vld [vmem:[#allocation3 + $0x1c] sm:$0xff] }
  0x18   :  { %61 = vst.msk [vmem:[#allocation3 + $0xb] sm:$0xff] %vm34_vm0, %v57_v16  ;;  %v415_v16 = vld [vmem:[#allocation3 + $0x24] sm:$0xff] }
  0x19   :  { %52 = vst.msk [vmem:[#allocation2 + $0x3] sm:$0xff] %vm34_vm0, %v48_v17 }
  0x1a   :  { %53 = vst.msk [vmem:[#allocation2 + $0xb] sm:$0xff] %vm34_vm0, %v49_v18 }
  0x1c   :  { %v66_v19 = vld [vmem:[#allocation2 + $0x18] sm:$0xff] }
  0x1d   :  { %v67_v20 = vld [vmem:[#allocation2 + $0x20] sm:$0xff] }
  0x1e   :  { %v69_v22 = vpack.c.bf16 %v67_v20, %v66_v19  ;;  %v70_v23 = vld [vmem:[#allocation3] sm:$0xff]  ;;  %v144_v42 = vld [vmem:[#allocation2 + $0x19] sm:$0xff]  ;;  %v145_v43 = vld [vmem:[#allocation2 + $0x21] sm:$0xff]  ;;  %v417_v20 = vpack.c.bf16 %v415_v16, %v414_v15 }
  0x1f   :  { %v71_v24 = vld [vmem:[#allocation3 + $0x8] sm:$0xff]  ;;  %v147_v46 = vpack.c.bf16 %v145_v43, %v144_v42  ;;  %v233_v53 = vld [vmem:[#allocation2 + $0x22] sm:$0xff] }
  0x20   :  { %855 = vmatmul.msk.bf16.vlgmr.msra.gmra.mxu3 %vm34_vm0, %v69_v22  ;;  %v74_v26 = vpack.c.bf16 %v71_v24, %v70_v23  ;;  %v64_v27 = vld [vmem:[#allocation2] sm:$0xff]  ;;  %v148_v34 = vld [vmem:[#allocation3 + $0x1] sm:$0xff] }
  0x21   :  { %v142_v28 = vld [vmem:[#allocation2 + $0x1] sm:$0xff]  ;;  %v143_v30 = vld [vmem:[#allocation2 + $0x9] sm:$0xff]  ;;  %390 = vmatpush.bf16.msra.mxu3 %v964_v21  ;;  %v149_v35 = vld [vmem:[#allocation3 + $0x9] sm:$0xff] }
  0x22   :  { %v65_v29 = vld [vmem:[#allocation2 + $0x8] sm:$0xff]  ;;  %848 = vmatmul.msk.bf16.vlgmr.msra.gmra.mxu0 %vm34_vm0, %v74_v26  ;;  %v146_v33 = vpack.c.bf16 %v143_v30, %v142_v28  ;;  %v152_v38 = vpack.c.bf16 %v149_v35, %v148_v34  ;;  %v236_v39 = vld [vmem:[#allocation3 + $0x2] sm:$0xff]  ;;  %v237_v40 = vld [vmem:[#allocation3 + $0xa] sm:$0xff] }
  0x23   :  { %v68_v32 = vpack.c.bf16 %v65_v29, %v64_v27  ;;  %440 = vmatpush.bf16.msra.mxu0 %v965_v25  ;;  %v230_v36 = vld [vmem:[#allocation2 + $0x2] sm:$0xff]  ;;  %v231_v37 = vld [vmem:[#allocation2 + $0xa] sm:$0xff]  ;;  %v240_v44 = vpack.c.bf16 %v237_v40, %v236_v39  ;;  %v232_v52 = vld [vmem:[#allocation2 + $0x1a] sm:$0xff] }
  0x24   :  { %v234_v41 = vpack.c.bf16 %v231_v37, %v230_v36  ;;  %v235_v57 = vpack.c.bf16 %v233_v53, %v232_v52  ;;  %v318_v58 = vld [vmem:[#allocation2 + $0x3] sm:$0xff]  ;;  %v319_v59 = vld [vmem:[#allocation2 + $0xb] sm:$0xff]  ;;  %v324_v62 = vld [vmem:[#allocation3 + $0x3] sm:$0xff] }
  0x25   :  { %854 = vmatmul.msk.bf16.vlgmr.msra.gmra.mxu1 %vm34_vm0, %v68_v32  ;;  %862 = vmatmul.msk.bf16.vlgmr.msrb.gmra.mxu2 %vm34_vm0, %v146_v33  ;;  %v322_v61 = vpack.c.bf16 %v319_v59, %v318_v58  ;;  %v325_v63 = vld [vmem:[#allocation3 + $0xb] sm:$0xff]  ;;  %v406_v0 = vld [vmem:[#allocation2 + $0x4] sm:$0xff]  ;;  %v407_v1 = vld [vmem:[#allocation2 + $0xc] sm:$0xff] }
  0x26   :  { %478 = vmatpush.bf16.msra.mxu1 %v966_v31  ;;  %528 = vmatpush.bf16.msrb.mxu2 %v967_v45  ;;  %v328_v2 = vpack.c.bf16 %v325_v63, %v324_v62  ;;  %v412_v3 = vld [vmem:[#allocation3 + $0x4] sm:$0xff]  ;;  %v413_v4 = vld [vmem:[#allocation3 + $0xc] sm:$0xff]  ;;  %v410_v5 = vpack.c.bf16 %v407_v1, %v406_v0  ;;  %v409_v13 = vld [vmem:[#allocation2 + $0x24] sm:$0xff] }
  0x27   :  { %v320_v6 = vld [vmem:[#allocation2 + $0x1b] sm:$0xff]  ;;  %v321_v7 = vld [vmem:[#allocation2 + $0x23] sm:$0xff]  ;;  %v416_v8 = vpack.c.bf16 %v413_v4, %v412_v3  ;;  %v495_v19 = vld [vmem:[#allocation2 + $0xd] sm:$0xff] }
  0x28   :  { %v323_v9 = vpack.c.bf16 %v321_v7, %v320_v6  ;;  %v408_v12 = vld [vmem:[#allocation2 + $0x1c] sm:$0xff]  ;;  %v494_v18 = vld [vmem:[#allocation2 + $0x5] sm:$0xff]  ;;  %v583_v25 = vld [vmem:[#allocation2 + $0xe] sm:$0xff] }
  0x29   :  { %v411_v17 = vpack.c.bf16 %v409_v13, %v408_v12  ;;  %v498_v21 = vpack.c.bf16 %v495_v19, %v494_v18  ;;  %v500_v22 = vld [vmem:[#allocation3 + $0x5] sm:$0xff]  ;;  %v501_v23 = vld [vmem:[#allocation3 + $0xd] sm:$0xff]  ;;  %v582_v24 = vld [vmem:[#allocation2 + $0x6] sm:$0xff] }
  0x2a   :  { %v504_v26 = vpack.c.bf16 %v501_v23, %v500_v22  ;;  %v588_v27 = vld [vmem:[#allocation3 + $0x6] sm:$0xff]  ;;  %v589_v28 = vld [vmem:[#allocation3 + $0xe] sm:$0xff]  ;;  %v586_v29 = vpack.c.bf16 %v583_v25, %v582_v24  ;;  %v502_v34 = vld [vmem:[#allocation3 + $0x1d] sm:$0xff] }
  0x2b   :  { %v496_v30 = vld [vmem:[#allocation2 + $0x1d] sm:$0xff]  ;;  %v497_v31 = vld [vmem:[#allocation2 + $0x25] sm:$0xff]  ;;  %v592_v32 = vpack.c.bf16 %v589_v28, %v588_v27  ;;  %v503_v35 = vld [vmem:[#allocation3 + $0x25] sm:$0xff] }
  0x2c   :  { %v499_v33 = vpack.c.bf16 %v497_v31, %v496_v30  ;;  %v584_v36 = vld [vmem:[#allocation2 + $0x1e] sm:$0xff]  ;;  %v585_v37 = vld [vmem:[#allocation2 + $0x26] sm:$0xff]  ;;  %v590_v39 = vld [vmem:[#allocation3 + $0x1e] sm:$0xff] }
  0x2d   :  { %v591_v40 = vld [vmem:[#allocation3 + $0x26] sm:$0xff] }
  0x2e   :  { %v593_v42 = vpack.c.bf16 %v591_v40, %v590_v39 }
  0x30   :  { %870 = vmatmul.msk.bf16.vlgmr.msrb.gmra.mxu3 %vm34_vm0, %v152_v38  ;;  %v505_v38 = vpack.c.bf16 %v503_v35, %v502_v34 }
  0x31   :  { %566 = vmatpush.bf16.msrb.mxu3 %v968_v47 }
  0x32   :  { %878 = vmatmul.msk.bf16.vlgmr.msrb.gmra.mxu0 %vm34_vm0, %v234_v41  ;;  %v587_v41 = vpack.c.bf16 %v585_v37, %v584_v36 }
  0x33   :  { %616 = vmatpush.bf16.msrb.mxu0 %v969_v48 }
  0x35   :  { %886 = vmatmul.msk.bf16.vlgmr.msrb.gmra.mxu1 %vm34_vm0, %v240_v44  ;;  %863 = vmatmul.msk.bf16.gmra.mxu2 %vm34_vm0, %v147_v46 }
  0x36   :  { %654 = vmatpush.bf16.msrb.mxu1 %v970_v49 }
  0x40   :  { %871 = vmatmul.msk.bf16.gmra.mxu3 %vm34_vm0, %v153_v54 }
  0x42   :  { %879 = vmatmul.msk.bf16.gmra.mxu0 %vm34_vm0, %v235_v57 }
  0x45   :  { %887 = vmatmul.msk.bf16.gmra.mxu1 %vm34_vm0, %v241_v60  ;;  %894 = vmatmul.msk.bf16.vlgmr.msra.gmra.mxu2 %vm34_vm0, %v322_v61 }
  0x50   :  { %902 = vmatmul.msk.bf16.vlgmr.msra.gmra.mxu3 %vm34_vm0, %v328_v2 }
  0x52   :  { %910 = vmatmul.msk.bf16.vlgmr.msra.gmra.mxu0 %vm34_vm0, %v410_v5 }
  0x55   :  { %918 = vmatmul.msk.bf16.vlgmr.msra.gmra.mxu1 %vm34_vm0, %v416_v8  ;;  %895 = vmatmul.msk.bf16.gmra.mxu2 %vm34_vm0, %v323_v9 }
  0x60   :  { %903 = vmatmul.msk.bf16.gmra.mxu3 %vm34_vm0, %v329_v14 }
  0x62   :  { %911 = vmatmul.msk.bf16.gmra.mxu0 %vm34_vm0, %v411_v17 }
  0x65   :  { %919 = vmatmul.msk.bf16.gmra.mxu1 %vm34_vm0, %v417_v20  ;;  %926 = vmatmul.msk.bf16.vlgmr.msrb.gmra.mxu2 %vm34_vm0, %v498_v21 }
  0x70   :  { %934 = vmatmul.msk.bf16.vlgmr.msrb.gmra.mxu3 %vm34_vm0, %v504_v26 }
  0x72   :  { %942 = vmatmul.msk.bf16.vlgmr.msrb.gmra.mxu0 %vm34_vm0, %v586_v29 }
  0x75   :  { %950 = vmatmul.msk.bf16.vlgmr.msrb.gmra.mxu1 %vm34_vm0, %v592_v32  ;;  %927 = vmatmul.msk.bf16.gmra.mxu2 %vm34_vm0, %v499_v33 }
  0x80   :  { %935 = vmatmul.msk.bf16.gmra.mxu3 %vm34_vm0, %v505_v38 }
  0x82   :  { %943 = vmatmul.msk.bf16.gmra.mxu0 %vm34_vm0, %v587_v41 }
  0x85   :  { %951 = vmatmul.msk.bf16.gmra.mxu1 %vm34_vm0, %v593_v42 }
  0x98   :  { %v106_v43 = vpop.f32.mrf.mxu2 }
  0x9f   :  { %v101_v44 = vpop.f32.mrf.mxu0 }
  0xa0   :  { %v108_v45 = vpop.f32.mrf.mxu2 }
  0xa2   :  { %v132_v46 = vpop.f32.mrf.mxu1 }
  0xa3   :  { %v133_v47 = vadd.f32 %v132_v46, %v101_v44  ;;  %v137_v48 = vpop.f32.mrf.mxu3 }
  0xa4   :  { %v138_v49 = vadd.f32 %v137_v48, %v106_v43 }
  0xa7   :  { %v103_v50 = vpop.f32.mrf.mxu0 }
  0xa8   :  { %v178_v51 = vpop.f32.mrf.mxu2 }
  0xa9   :  { %v188_v53 = vadd.f32 %v178_v51, %v133_v47 }
  0xaa   :  { %v134_v52 = vpop.f32.mrf.mxu1 }
  0xab   :  { %v135_v54 = vadd.f32 %v134_v52, %v103_v50  ;;  %v139_v55 = vpop.f32.mrf.mxu3 }
  0xac   :  { %v140_v56 = vadd.f32 %v139_v55, %v108_v45 }
  0xaf   :  { %v266_v57 = vpop.f32.mrf.mxu0 }
  0xb0   :  { %v180_v58 = vpop.f32.mrf.mxu2 }
  0xb1   :  { %v189_v21 = vadd.f32 %v180_v58, %v135_v54 }
  0xb2   :  { %v304_v59 = vpop.f32.mrf.mxu1 }
  0xb3   :  { %v216_v60 = vpop.f32.mrf.mxu3 }
  0xb4   :  { %v226_v61 = vadd.f32 %v216_v60, %v188_v53 }
  0xb6   :  { %v276_v62 = vadd.f32 %v266_v57, %v226_v61 }
  0xb7   :  { %v268_v63 = vpop.f32.mrf.mxu0 }
  0xb8   :  { %v183_v0 = vpop.f32.mrf.mxu2  ;;  %v314_v1 = vadd.f32 %v304_v59, %v276_v62 }
  0xb9   :  { %v190_v26 = vadd.f32 %v183_v0, %v138_v49 }
  0xba   :  { %v306_v2 = vpop.f32.mrf.mxu1 }
  0xbb   :  { %v218_v3 = vpop.f32.mrf.mxu3 }
  0xbc   :  { %v227_v25 = vadd.f32 %v218_v3, %v189_v21 }
  0xbe   :  { %v277_v28 = vadd.f32 %v268_v63, %v227_v25 }
  0xbf   :  { %v271_v4 = vpop.f32.mrf.mxu0 }
  0xc0   :  { %v185_v5 = vpop.f32.mrf.mxu2  ;;  %v315_v35 = vadd.f32 %v306_v2, %v277_v28 }
  0xc1   :  { %v191_v34 = vadd.f32 %v185_v5, %v140_v56 }
  0xc2   :  { %v309_v6 = vpop.f32.mrf.mxu1 }
  0xc3   :  { %v221_v7 = vpop.f32.mrf.mxu3 }
  0xc4   :  { %v228_v29 = vadd.f32 %v221_v7, %v190_v26 }
  0xc6   :  { %v278_v33 = vadd.f32 %v271_v4, %v228_v29 }
  0xc7   :  { %v273_v8 = vpop.f32.mrf.mxu0 }
  0xc8   :  { %v354_v9 = vpop.f32.mrf.mxu2  ;;  %v316_v40 = vadd.f32 %v309_v6, %v278_v33 }
  0xc9   :  { %v364_v39 = vadd.f32 %v354_v9, %v314_v1 }
  0xca   :  { %v311_v10 = vpop.f32.mrf.mxu1 }
  0xcb   :  { %v223_v11 = vpop.f32.mrf.mxu3 }
  0xcc   :  { %v229_v38 = vadd.f32 %v223_v11, %v191_v34 }
  0xce   :  { %v279_v46 = vadd.f32 %v273_v8, %v229_v38 }
  0xcf   :  { %v442_v12 = vpop.f32.mrf.mxu0 }
  0xd0   :  { %v356_v13 = vpop.f32.mrf.mxu2  ;;  %v317_v51 = vadd.f32 %v311_v10, %v279_v46 }
  0xd1   :  { %v365_v36 = vadd.f32 %v356_v13, %v315_v35 }
  0xd2   :  { %v480_v14 = vpop.f32.mrf.mxu1 }
  0xd3   :  { %v392_v15 = vpop.f32.mrf.mxu3 }
  0xd4   :  { %v402_v47 = vadd.f32 %v392_v15, %v364_v39 }
  0xd6   :  { %v452_v50 = vadd.f32 %v442_v12, %v402_v47 }
  0xd7   :  { %v444_v16 = vpop.f32.mrf.mxu0 }
  0xd8   :  { %v359_v17 = vpop.f32.mrf.mxu2  ;;  %v490_v59 = vadd.f32 %v480_v14, %v452_v50 }
  0xd9   :  { %v366_v44 = vadd.f32 %v359_v17, %v316_v40 }
  0xda   :  { %v482_v18 = vpop.f32.mrf.mxu1 }
  0xdb   :  { %v394_v19 = vpop.f32.mrf.mxu3 }
  0xdc   :  { %v403_v43 = vadd.f32 %v394_v19, %v365_v36 }
  0xde   :  { %v453_v48 = vadd.f32 %v444_v16, %v403_v43 }
  0xdf   :  { %v447_v20 = vpop.f32.mrf.mxu0 }
  0xe0   :  { %v361_v22 = vpop.f32.mrf.mxu2  ;;  %v491_v55 = vadd.f32 %v482_v18, %v453_v48 }
  0xe1   :  { %v367_v54 = vadd.f32 %v361_v22, %v317_v51 }
  0xe2   :  { %v485_v23 = vpop.f32.mrf.mxu1 }
  0xe3   :  { %v397_v24 = vpop.f32.mrf.mxu3 }
  0xe4   :  { %v404_v49 = vadd.f32 %v397_v24, %v366_v44 }
  0xe6   :  { %v454_v53 = vadd.f32 %v447_v20, %v404_v49 }
  0xe7   :  { %v449_v27 = vpop.f32.mrf.mxu0 }
  0xe8   :  { %v530_v30 = vpop.f32.mrf.mxu2  ;;  %v492_v63 = vadd.f32 %v485_v23, %v454_v53 }
  0xe9   :  { %v540_v62 = vadd.f32 %v530_v30, %v490_v59  ;;  %v1020_v30 = vmov 512.0  }
  0xea   :  { %v487_v31 = vpop.f32.mrf.mxu1  ;;  %984 = vrcp.f32 %v1020_v30 }
  0xeb   :  { %v399_v32 = vpop.f32.mrf.mxu3 }
  0xec   :  { %v405_v61 = vadd.f32 %v399_v32, %v367_v54 }
  0xee   :  { %v455_v2 = vadd.f32 %v449_v27, %v405_v61 }
  0xef   :  { %v618_v37 = vpop.f32.mrf.mxu0 }
  0xf0   :  { %v532_v41 = vpop.f32.mrf.mxu2  ;;  %v493_v12 = vadd.f32 %v487_v31, %v455_v2  ;;  %v985_v31 = vpop.eup %984 }
  0xf1   :  { %v541_v60 = vadd.f32 %v532_v41, %v491_v55  ;;  %v687_v32 = vmul.f32 512.0, %v985_v31  ;;  %vm691_vm2 = vweird.f32 %v985_v31 }
  0xf2   :  { %v656_v42 = vpop.f32.mrf.mxu1 }
  0xf3   :  { %v568_v45 = vpop.f32.mrf.mxu3  ;;  %v688_v33 = vsub.f32 1.0, %v687_v32 }
  0xf4   :  { %v578_v3 = vadd.f32 %v568_v45, %v540_v62 }
  0xf6   :  { %v628_v10 = vadd.f32 %v618_v37, %v578_v3  ;;  %v689_v37 = vmul.f32 %v985_v31, %v688_v33 }
  0xf7   :  { %v620_v52 = vpop.f32.mrf.mxu0 }
  0xf8   :  { %v535_v56 = vpop.f32.mrf.mxu2  ;;  %v666_v14 = vadd.f32 %v656_v42, %v628_v10  ;;  %v690_v40 = vadd.f32 %v985_v31, %v689_v37 }
  0xf9   :  { %v542_v1 = vadd.f32 %v535_v56, %v492_v63 }
  0xfa   :  { %v658_v57 = vpop.f32.mrf.mxu1  ;;  %v670_v22 = vsel %vm34_vm0, %v666_v14, 0.0  ;;  %v692_v43 = vsel %vm691_vm2, %v985_v31, %v690_v40 }
  0xfb   :  { %v570_v58 = vpop.f32.mrf.mxu3 }
  0xfc   :  { %v579_v0 = vadd.f32 %v570_v58, %v541_v60 }
  0xfe   :  { %v629_v6 = vadd.f32 %v620_v52, %v579_v0 }
  0xff   :  { %v623_v4 = vpop.f32.mrf.mxu0 }
 0x100   :  { %v537_v9 = vpop.f32.mrf.mxu2  ;;  %v667_v13 = vadd.f32 %v658_v57, %v629_v6 }
 0x101   :  { %v543_v15 = vadd.f32 %v537_v9, %v493_v12  ;;  %v748_v12 = vstv %s747_s16 }
 0x102   :  { %v661_v8 = vpop.f32.mrf.mxu1  ;;  %v671_v19 = vsel %vm34_vm0, %v667_v13, 0.0 }
 0x103   :  { %v573_v5 = vpop.f32.mrf.mxu3  ;;  %v672_v25 = vadd.f32 %v671_v19, %v670_v22 }
 0x104   :  { %v580_v7 = vadd.f32 %v573_v5, %v542_v1 }
 0x106   :  { %v630_v11 = vadd.f32 %v623_v4, %v580_v7 }
 0x107   :  { %v625_v20 = vpop.f32.mrf.mxu0 }
 0x108   :  { %v668_v16 = vadd.f32 %v661_v8, %v630_v11 }
 0x10a   :  { %v673_v23 = vsel %vm34_vm0, %v668_v16, 0.0  ;;  %v663_v24 = vpop.f32.mrf.mxu1 }
 0x10b   :  { %v575_v17 = vpop.f32.mrf.mxu3  ;;  %v674_v27 = vadd.f32 %v673_v23, %v672_v25 }
 0x10c   :  { %v581_v18 = vadd.f32 %v575_v17, %v543_v15  ;;  %v754_v17 = vstv %s952_s17 }
 0x10e   :  { %v631_v21 = vadd.f32 %v625_v20, %v581_v18 }
 0x110   :  { %v669_v26 = vadd.f32 %v663_v24, %v631_v21 }
 0x112   :  { %v675_v28 = vsel %vm34_vm0, %v669_v26, 0.0 }
 0x113   :  { %v676_v29 = vadd.f32 %v675_v28, %v674_v27 }
 0x115   :  { %677 = vadd.xlane.f32.xlu0 %v676_v29 }
 0x188   :  { %v678_v34 = vpop.xlane.xlu0 %677 }
 0x189   :  { %v679_v35 = vrot.slane %v678_v34, 4 }
 0x18b   :  { %v680_v36 = vadd.f32 %v679_v35, %v678_v34 }
 0x18d   :  { %v681_v38 = vrot.slane %v680_v36, 2 }
 0x18f   :  { %v682_v39 = vadd.f32 %v681_v38, %v680_v36 }
 0x191   :  { %v683_v41 = vrot.slane %v682_v39, 1 }
 0x193   :  { %v684_v42 = vadd.f32 %v683_v41, %v682_v39 }
 0x195   :  { %973 = vpush %v684_v42 }
 0x196   :  { %975 = vpush %v692_v43 }
 0x1c6   :  { %s974_s2 = spop %973 }
 0x1c7   :  { %s1172_s3 = spop %975 }
 0x1c8   :  { %s694_s12 = smul.f32 %s1172_s3, %s974_s2 }
 0x1ca   :  { %v695_v44 = vstv %s694_s12 }
 0x1cb   :  { %v696_v45 = vsub.f32 %v666_v14, %v695_v44  ;;  %v697_v46 = vsub.f32 %v667_v13, %v695_v44  ;;  %v698_v47 = vsub.f32 %v668_v16, %v695_v44  ;;  %v699_v48 = vsub.f32 %v669_v26, %v695_v44 }
 0x1cd   :  { %v700_v49 = vmul.f32 %v696_v45, %v696_v45  ;;  %v701_v50 = vmul.f32 %v697_v46, %v697_v46  ;;  %v702_v51 = vmul.f32 %v698_v47, %v698_v47  ;;  %v703_v52 = vmul.f32 %v699_v48, %v699_v48 }
 0x1cf   :  { %v704_v53 = vsel %vm34_vm0, %v700_v49, 0.0  ;;  %v705_v54 = vsel %vm34_vm0, %v701_v50, 0.0  ;;  %v707_v56 = vsel %vm34_vm0, %v702_v51, 0.0  ;;  %v709_v58 = vsel %vm34_vm0, %v703_v52, 0.0 }
 0x1d0   :  { %v706_v55 = vadd.f32 %v705_v54, %v704_v53 }
 0x1d2   :  { %v708_v57 = vadd.f32 %v707_v56, %v706_v55 }
 0x1d4   :  { %v710_v59 = vadd.f32 %v709_v58, %v708_v57 }
 0x1d6   :  { %711 = vadd.xlane.f32.xlu0 %v710_v59 }
 0x249   :  { %v712_v60 = vpop.xlane.xlu0 %711 }
 0x24a   :  { %v713_v61 = vrot.slane %v712_v60, 4 }
 0x24c   :  { %v714_v62 = vadd.f32 %v713_v61, %v712_v60 }
 0x24e   :  { %v715_v63 = vrot.slane %v714_v62, 2 }
 0x250   :  { %v716_v0 = vadd.f32 %v715_v63, %v714_v62 }
 0x252   :  { %v717_v1 = vrot.slane %v716_v0, 1 }
 0x254   :  { %v718_v2 = vadd.f32 %v717_v1, %v716_v0 }
 0x256   :  { %977 = vpush %v718_v2 }
 0x287   :  { %s978_s13 = spop %977 }
 0x288   :  { %s728_s14 = smul.f32 %s978_s13, %s1172_s3 }
 0x28a   :  { %s729_s15 = sadd.f32 1e-05, %s728_s14 }
 0x28c   :  { %v730_v3 = vstv %s729_s15 }
 0x28d   :  { %986 = vrsqrt.f32 %v730_v3  ;;  %vm737_vm4 = vweird.f32 %v730_v3 }
 0x293   :  { %v987_v4 = vpop.eup %986 }
 0x294   :  { %v732_v5 = vmul.f32 %v987_v4, %v730_v3  ;;  %vm738_vm3 = vweird.f32 %v987_v4 }
 0x295   :  { %vm739_vm5 = vmor %vm737_vm4, %vm738_vm3 }
 0x296   :  { %v733_v6 = vmul.f32 %v987_v4, %v732_v5 }
 0x298   :  { %v734_v7 = vmul.f32 0.5, %v733_v6 }
 0x29a   :  { %v735_v8 = vsub.f32 1.5, %v734_v7 }
 0x29c   :  { %v736_v9 = vmul.f32 %v987_v4, %v735_v8 }
 0x29e   :  { %v740_v10 = vsel %vm739_vm5, %v987_v4, %v736_v9 }
 0x29f   :  { %979 = vpush %v740_v10 }
 0x2d0   :  { %s980_s18 = spop %979 }
 0x2d1   :  { %v742_v11 = vstv %s980_s18 }
 0x2d2   :  { %v743_v13 = vmul.f32 %v742_v11, %v696_v45  ;;  %v744_v15 = vmul.f32 %v742_v11, %v697_v46  ;;  %v745_v14 = vmul.f32 %v742_v11, %v698_v47  ;;  %v746_v16 = vmul.f32 %v742_v11, %v699_v48 }
 0x2d4   :  { %v749_v18 = vmul.f32 %v748_v12, %v743_v13  ;;  %v750_v19 = vmul.f32 %v748_v12, %v744_v15  ;;  %v751_v20 = vmul.f32 %v748_v12, %v745_v14  ;;  %v752_v21 = vmul.f32 %v748_v12, %v746_v16 }
 0x2d6   :  { %v755_v22 = vadd.f32 %v754_v17, %v749_v18  ;;  %v756_v23 = vadd.f32 %v754_v17, %v750_v19  ;;  %v757_v24 = vadd.f32 %v754_v17, %v751_v20  ;;  %v758_v25 = vadd.f32 %v754_v17, %v752_v21 }
 0x2d8   :  { %v953_v26 = vmul.f32 -1.442695, %v755_v22  ;;  %v954_v27 = vmul.f32 -1.442695, %v756_v23  ;;  %v955_v28 = vmul.f32 -1.442695, %v757_v24 }
 0x2d9   :  { %v956_v29 = vmul.f32 -1.442695, %v758_v25 }
 0x2da   :  { %988 = vpow2.f32 %v953_v26 }
 0x2db   :  { %990 = vpow2.f32 %v954_v27 }
 0x2dc   :  { %992 = vpow2.f32 %v955_v28 }
 0x2dd   :  { %994 = vpow2.f32 %v956_v29 }
 0x2e0   :  { %v989_v30 = vpop.eup %988 }
 0x2e1   :  { %v991_v31 = vpop.eup %990  ;;  %v771_v32 = vadd.f32 1.0, %v989_v30 }
 0x2e2   :  { %v993_v33 = vpop.eup %992  ;;  %v772_v34 = vadd.f32 1.0, %v991_v31 }
 0x2e3   :  { %v995_v35 = vpop.eup %994  ;;  %v773_v36 = vadd.f32 1.0, %v993_v33  ;;  %996 = vrcp.f32 %v771_v32  ;;  %v784_v38 = vand.u32 2147483647, %v771_v32  ;;  %v786_v40 = vand.u32 2147483648, %v771_v32 }
 0x2e4   :  { %v774_v37 = vadd.f32 1.0, %v995_v35  ;;  %998 = vrcp.f32 %v772_v34  ;;  %vm780_vm6 = vweird.f32 %v771_v32  ;;  %vm795_vm7 = vweird.f32 %v772_v34 }
 0x2e5   :  { %1000 = vrcp.f32 %v773_v36  ;;  %v799_v45 = vand.u32 2147483647, %v772_v34  ;;  %vm1180_vm8 = vcmp.eq.f32.partialorder %v784_v38, 8.507059e+37  ;;  %v801_v48 = vand.u32 2147483648, %v772_v34 }
 0x2e6   :  { %1002 = vrcp.f32 %v774_v37  ;;  %v787_v51 = vor.u32 1.1754944e-38, %v786_v40  ;;  %vm810_vm9 = vweird.f32 %v773_v36  ;;  %v814_v53 = vand.u32 2147483647, %v773_v36 }
 0x2e7   :  { %vm1184_vm12 = vcmp.eq.f32.partialorder %v799_v45, 8.507059e+37  ;;  %v816_v59 = vand.u32 2147483648, %v773_v36  ;;  %v802_v0 = vor.u32 1.1754944e-38, %v801_v48  ;;  %v829_v1 = vand.u32 2147483647, %v774_v37 }
 0x2e8   :  { %v831_v2 = vand.u32 2147483648, %v774_v37  ;;  %vm825_vm3 = vweird.f32 %v774_v37  ;;  %vm815_vm4 = vcmp.eq.f32.partialorder %v814_v53, 8.507059e+37 }
 0x2e9   :  { %v997_v39 = vpop.eup %996  ;;  %v817_v8 = vor.u32 1.1754944e-38, %v816_v59 }
 0x2ea   :  { %v999_v41 = vpop.eup %998  ;;  %v776_v42 = vmul.f32 %v997_v39, %v771_v32  ;;  %vm781_vm10 = vweird.f32 %v997_v39  ;;  %v832_v13 = vor.u32 1.1754944e-38, %v831_v2 }
 0x2eb   :  { %v1001_v43 = vpop.eup %1000  ;;  %v791_v44 = vmul.f32 %v999_v41, %v772_v34  ;;  %vm796_vm11 = vweird.f32 %v999_v41  ;;  %vm782_vm14 = vmor %vm780_vm6, %vm781_vm10  ;;  %vm830_vm6 = vcmp.eq.f32.partialorder %v829_v1, 8.507059e+37 }
 0x2ec   :  { %v777_v46 = vsub.f32 1.0, %v776_v42  ;;  %v806_v49 = vmul.f32 %v1001_v43, %v773_v36  ;;  %v1003_v50 = vpop.eup %1002  ;;  %vm811_vm13 = vweird.f32 %v1001_v43  ;;  %vm797_vm15 = vmor %vm795_vm7, %vm796_vm11 }
 0x2ed   :  { %v792_v52 = vsub.f32 1.0, %v791_v44  ;;  %v821_v56 = vmul.f32 %v1003_v50, %v774_v37  ;;  %vm826_vm1 = vweird.f32 %v1003_v50  ;;  %vm812_vm2 = vmor %vm810_vm9, %vm811_vm13 }
 0x2ee   :  { %v778_v54 = vmul.f32 %v997_v39, %v777_v46  ;;  %v807_v55 = vsub.f32 1.0, %v806_v49  ;;  %vm827_vm5 = vmor %vm825_vm3, %vm826_vm1 }
 0x2ef   :  { %v793_v57 = vmul.f32 %v999_v41, %v792_v52  ;;  %v822_v62 = vsub.f32 1.0, %v821_v56 }
 0x2f0   :  { %v779_v60 = vadd.f32 %v997_v39, %v778_v54  ;;  %v808_v61 = vmul.f32 %v1001_v43, %v807_v55 }
 0x2f1   :  { %v794_v63 = vadd.f32 %v999_v41, %v793_v57  ;;  %v823_v5 = vmul.f32 %v1003_v50, %v822_v62 }
 0x2f2   :  { %v783_v3 = vsel %vm782_vm14, %v997_v39, %v779_v60  ;;  %v809_v4 = vadd.f32 %v1001_v43, %v808_v61 }
 0x2f3   :  { %v788_v6 = vsel %vm1180_vm8, %v787_v51, %v783_v3  ;;  %v798_v7 = vsel %vm797_vm15, %v999_v41, %v794_v63  ;;  %v824_v11 = vadd.f32 %v1003_v50, %v823_v5 }
 0x2f4   :  { %v803_v9 = vsel %vm1184_vm12, %v802_v0, %v798_v7  ;;  %v813_v10 = vsel %vm812_vm2, %v1001_v43, %v809_v4  ;;  %835 = vst.msk [vmem:[%s1216_s5] sm:$0xff] %vm34_vm0, %v788_v6 }
 0x2f5   :  { %v818_v12 = vsel %vm815_vm4, %v817_v8, %v813_v10  ;;  %836 = vst.msk [vmem:[%s1216_s5 + $0x8] sm:$0xff] %vm34_vm0, %v803_v9  ;;  %v828_v15 = vsel %vm827_vm5, %v1003_v50, %v824_v11 }
 0x2f6   :  { %837 = vst.msk [vmem:[%s1216_s5 + $0x10] sm:$0xff] %vm34_vm0, %v818_v12  ;;  %v833_v14 = vsel %vm830_vm6, %v832_v13, %v828_v15 }
 0x2f7   :  { %838 = vst.msk [vmem:[%s1216_s5 + $0x18] sm:$0xff] %vm34_vm0, %v833_v14 }
 0x2f8   :  { %843 = vsyncpa [#allocation5], 1 }

</bundles_post_ra>
